<compile_context>
chip_gen: v6e
topology: v6e:2x2x1
jax: 0.10.0
libtpu: 0.0.40
codegen_flags: <defaults>
</compile_context>

<pallas_src>
import functools

import jax
import jax.numpy as jnp
from jax.experimental import pallas as pl
from jax.experimental.pallas import tpu as pltpu

EPS = 1e-12  # BERT LayerNorm eps

# row indices of the packed per-block vector bundle (n_blocks, 9, H)
_BQ, _BK, _BV, _BO, _G1, _BE1, _B2, _G2, _BE2 = range(9)
_N_VEC = 9


def _layer_norm(x, gamma, beta):
    mean = jnp.mean(x, axis=-1, keepdims=True)
    var = jnp.mean(jnp.square(x - mean), axis=-1, keepdims=True)
    return (x - mean) * jax.lax.rsqrt(var + EPS) * gamma + beta


def _gelu(x):
    # tanh approximation of GELU (BERT "gelu_new" style)
    # TODO(synk): switch to the exact erf GELU if the reference AttentionBlock uses torch.nn.GELU.
    c = 0.7978845608028654
    return 0.5 * x * (1.0 + jnp.tanh(c * (x + 0.044715 * x * x * x)))


# ---------------------------------------------------------------------------
# Fused kernel: embed-LN + n_blocks attention blocks + BertPooler
# grid = (B // Bt, n_blocks); activation (Bt*S, H) stays resident in VMEM across blocks.
# ---------------------------------------------------------------------------
def fused_submodal_kernel(emb_ref, emb_g_ref, emb_b_ref,
                          wqkv_ref, wo_ref, wi_ref, bi_ref, w2_ref, vec_ref,
                          pool_w_ref, pool_b_ref,
                          pooled_ref, x_scratch,
                          *, n_heads, head_dim, batch_tile, seq_len):
    l = pl.program_id(1)
    H = n_heads * head_dim
    M = batch_tile * seq_len

    vec = vec_ref[0]                       # (9, H) f32: packed per-block biases / LN params

    # First block iteration for this batch tile: embedding LayerNorm into the resident
    # VMEM activation buffer (embeddings arrive bf16, LN math in f32).
    @pl.when(l == 0)
    def _():
        emb = emb_ref[...].reshape(M, H).astype(jnp.float32)
        x_scratch[...] = _layer_norm(emb, emb_g_ref[...], emb_b_ref[...])

    x = x_scratch[...]                     # (M, H) f32, resident across the block axis
    xb = x.astype(jnp.bfloat16)

    # ---- self attention: fused QKV projection (single MXU pass, N = 3H) ----
    qkv = jnp.dot(xb, wqkv_ref[0], preferred_element_type=jnp.float32)   # (M, 3H)
    scale = 1.0 / (float(head_dim) ** 0.5)
    q = (qkv[:, 0 * H:1 * H] + vec[_BQ:_BQ + 1, :]) * scale   # fold softmax scale into q
    k = qkv[:, 1 * H:2 * H] + vec[_BK:_BK + 1, :]
    v = qkv[:, 2 * H:3 * H] + vec[_BV:_BV + 1, :]

    # head-major layout once per block: (Bt*S, H) -> (Bt*nh, S, hd)
    def to_heads(t):
        t = t.reshape(batch_tile, seq_len, n_heads, head_dim)
        t = jnp.transpose(t, (0, 2, 1, 3))
        return t.reshape(batch_tile * n_heads, seq_len, head_dim).astype(jnp.bfloat16)

    qh, kh, vh = to_heads(q), to_heads(k), to_heads(v)

    s = jnp.einsum('gqd,gkd->gqk', qh, kh, preferred_element_type=jnp.float32)
    s = s - jnp.max(s, axis=-1, keepdims=True)
    p = jnp.exp(s)
    p = p * pl.reciprocal(jnp.sum(p, axis=-1, keepdims=True), approx=True)

    ctx = jnp.einsum('gqk,gkd->gqd', p.astype(jnp.bfloat16), vh,
                     preferred_element_type=jnp.float32)
    ctx = ctx.reshape(batch_tile, n_heads, seq_len, head_dim)
    ctx = jnp.transpose(ctx, (0, 2, 1, 3)).reshape(M, H)

    attn_out = jnp.dot(ctx.astype(jnp.bfloat16), wo_ref[0],
                       preferred_element_type=jnp.float32) + vec[_BO:_BO + 1, :]
    h1 = _layer_norm(attn_out + x, vec[_G1:_G1 + 1, :], vec[_BE1:_BE1 + 1, :])

    # ---- feed-forward ----
    # TODO(synk): tile over the intermediate dim I and KV-tile the softmax (online softmax)
    # once S / I grow beyond the per-generation VMEM budget (v7x: 64 MiB per TC).
    inter = _gelu(jnp.dot(h1.astype(jnp.bfloat16), wi_ref[0],
                          preferred_element_type=jnp.float32) + bi_ref[0])
    ffn = jnp.dot(inter.astype(jnp.bfloat16), w2_ref[0],
                  preferred_element_type=jnp.float32) + vec[_B2:_B2 + 1, :]
    x_new = _layer_norm(ffn + h1, vec[_G2:_G2 + 1, :], vec[_BE2:_BE2 + 1, :])
    x_scratch[...] = x_new

    # ---- BertPooler on the last block: dense + tanh on each sequence's CLS token ----
    @pl.when(l == pl.num_programs(1) - 1)
    def _():
        cls = x_new.reshape(batch_tile, seq_len, H)[:, 0, :]              # (Bt, H)
        pooled = jnp.tanh(
            jnp.dot(cls.astype(jnp.bfloat16), pool_w_ref[...],
                    preferred_element_type=jnp.float32) + pool_b_ref[...])
        pooled_ref[...] = pooled.reshape(batch_tile, 1, H).astype(pooled_ref.dtype)


# ---------------------------------------------------------------------------
# VMEM-aware sizing helpers
# ---------------------------------------------------------------------------
def _vmem_limit_bytes():
    cap = 128 * 1024 * 1024
    try:
        info = pltpu.get_tpu_info()
        cap = int(getattr(info, 'vmem_capacity_bytes', cap) or cap)
    except Exception:
        pass
    # ~20% headroom for compiler-internal scratch; v5e/v6e -> ~102 MiB, v7x -> ~51 MiB.
    return max(32 * 1024 * 1024, min(int(cap * 0.8), 112 * 1024 * 1024))


def _choose_batch_tile(B, S, H, I, n_heads, vmem_bytes):
    # rough f32 live bytes per sequence inside one block step: resident activation +
    # qkv/ctx temporaries + (nh, S, S) scores + FFN intermediate.
    per_seq = 4 * (6 * S * H + n_heads * S * S + S * I)
    bt = max(1, min(B, (vmem_bytes // 4) // max(per_seq, 1)))
    if B >= 2 and B // bt < 2:
        bt = max(1, B // 2)       # keep >= 2 tiles on the "parallel" axis (megacore / 2 TCs)
    while B % bt:                  # must divide B evenly
        bt -= 1
    return bt


# ---------------------------------------------------------------------------
# Wrapper
# ---------------------------------------------------------------------------
def submodal_notes_forward(token_ids, params, *, batch_tile=None):
    B, S = token_ids.shape
    H = params['word_emb'].shape[-1]
    n_heads = params['n_heads']
    head_dim = H // n_heads
    n_blocks = params['wqkv'].shape[0]
    I = params['wi'].shape[-1]

    vmem_limit = _vmem_limit_bytes()
    if batch_tile is None:
        batch_tile = _choose_batch_tile(B, S, H, I, n_heads, vmem_limit)
    assert B % batch_tile == 0

    # embedding gather (glue) — word + position embeddings, shipped bf16 (pre-LayerNorm)
    emb = (params['word_emb'][token_ids] + params['pos_emb'][None, :S, :]).astype(jnp.bfloat16)

    def per_block(a):   # stacked per-block param (n_blocks, d0, d1): pick block l
        return pl.BlockSpec((1,) + a.shape[1:], lambda b, l: (l, 0, 0))

    def shared(a):      # block-invariant param
        zeros = (0,) * a.ndim
        return pl.BlockSpec(a.shape, lambda b, l: zeros)

    inputs = (emb, params['emb_g'], params['emb_b'],
              params['wqkv'], params['wo'], params['wi'], params['bi'], params['w2'],
              params['vecs'], params['pool_w'], params['pool_b'])

    in_specs = [
        pl.BlockSpec((batch_tile, S, H), lambda b, l: (b, 0, 0)),   # embeddings (per tile)
        shared(params['emb_g']), shared(params['emb_b']),
        per_block(params['wqkv']), per_block(params['wo']),
        per_block(params['wi']), per_block(params['bi']), per_block(params['w2']),
        per_block(params['vecs']),
        shared(params['pool_w']), shared(params['pool_b']),
    ]

    kern = functools.partial(fused_submodal_kernel, n_heads=n_heads, head_dim=head_dim,
                             batch_tile=batch_tile, seq_len=S)

    pooled = pl.pallas_call(
        kern,
        out_shape=jax.ShapeDtypeStruct((B, 1, H), jnp.float32),
        grid=(B // batch_tile, n_blocks),
        in_specs=in_specs,
        out_specs=pl.BlockSpec((batch_tile, 1, H), lambda b, l: (b, 0, 0)),
        scratch_shapes=[pltpu.VMEM((batch_tile * S, H), jnp.float32)],
        compiler_params=pltpu.CompilerParams(
            dimension_semantics=("parallel", "arbitrary"),
            vmem_limit_bytes=vmem_limit),
    )(*inputs)
    return pooled[:, 0, :]                                            # (B, H)


# ---------------------------------------------------------------------------
# Deterministic parameter init (synthetic; shapes follow a BERT-style config).
# Per-block weights stacked along a leading n_blocks axis; QKV fused to (H, 3H);
# all per-block (1,H) vectors packed into one (n_blocks, 9, H) bundle.
# ---------------------------------------------------------------------------
def init_params(key, *, vocab, max_pos, hidden, intermediate, n_blocks, n_heads):
    H, I = hidden, intermediate
    keys = jax.random.split(key, 12)

    def dense(k, shape, dtype=jnp.bfloat16):
        return (0.02 * jax.random.normal(k, shape, dtype=jnp.float32)).astype(dtype)

    vk = jax.random.split(keys[7], 5)
    bq = dense(vk[0], (n_blocks, H), jnp.float32)
    bk = dense(vk[1], (n_blocks, H), jnp.float32)
    bv = dense(vk[2], (n_blocks, H), jnp.float32)
    bo = dense(vk[3], (n_blocks, H), jnp.float32)
    b2 = dense(vk[4], (n_blocks, H), jnp.float32)
    ones = jnp.ones((n_blocks, H), jnp.float32)
    zeros = jnp.zeros((n_blocks, H), jnp.float32)
    # rows: [bq, bk, bv, bo, g1, be1, b2, g2, be2]
    vecs = jnp.stack([bq, bk, bv, bo, ones, zeros, b2, ones, zeros], axis=1)

    params = {
        'n_heads': n_heads,
        'word_emb': dense(keys[0], (vocab, H), jnp.float32),
        'pos_emb': dense(keys[1], (max_pos, H), jnp.float32),
        'emb_g': jnp.ones((1, H), jnp.float32),
        'emb_b': jnp.zeros((1, H), jnp.float32),
        # stacked per-block matmul weights (bf16); fused QKV
        'wqkv': dense(keys[2], (n_blocks, H, 3 * H)),
        'wo': dense(keys[3], (n_blocks, H, H)),
        'wi': dense(keys[4], (n_blocks, H, I)),
        'bi': dense(keys[5], (n_blocks, 1, I), jnp.float32),
        'w2': dense(keys[6], (n_blocks, I, H)),
        'vecs': vecs,                                   # (n_blocks, 9, H) f32
        'pool_w': dense(keys[8], (H, H)),
        'pool_b': dense(keys[9], (1, H), jnp.float32),
    }
    return params


if __name__ == "__main__":
    # config: n_blocks=2, hidden=32, heads=4, intermediate=64, vocab=50, seq=8, batch=2
    B, S, H, I = 2, 8, 32, 64
    N_BLOCKS, N_HEADS = 2, 4
    VOCAB, MAX_POS = 50, 16

    key = jax.random.PRNGKey(0)
    k_params, k_ids = jax.random.split(key)
    params = init_params(k_params, vocab=VOCAB, max_pos=MAX_POS, hidden=H,
                         intermediate=I, n_blocks=N_BLOCKS, n_heads=N_HEADS)
    token_ids = jax.random.randint(k_ids, (B, S), 0, VOCAB, dtype=jnp.int32)

    pooled = submodal_notes_forward(token_ids, params)
    pooled = jax.block_until_ready(pooled)
    assert pooled.shape == (B, H) and pooled.dtype == jnp.float32
    assert bool(jnp.all(jnp.isfinite(pooled)))
    print("KERNEL_OK")
</pallas_src>

<mosaic_0001>
module attributes {stable_mosaic.version = 11 : i64} {
  func.func @fused_submodal_kernel(%arg0: i32, %arg1: i32, %arg2: memref<1x8x32xbf16, #tpu.memory_space<vmem>>, %arg3: memref<1x32xf32, #tpu.memory_space<vmem>>, %arg4: memref<1x32xf32, #tpu.memory_space<vmem>>, %arg5: memref<1x32x96xbf16, #tpu.memory_space<vmem>>, %arg6: memref<1x32x32xbf16, #tpu.memory_space<vmem>>, %arg7: memref<1x32x64xbf16, #tpu.memory_space<vmem>>, %arg8: memref<1x1x64xf32, #tpu.memory_space<vmem>>, %arg9: memref<1x64x32xbf16, #tpu.memory_space<vmem>>, %arg10: memref<1x9x32xf32, #tpu.memory_space<vmem>>, %arg11: memref<32x32xbf16, #tpu.memory_space<vmem>>, %arg12: memref<1x32xf32, #tpu.memory_space<vmem>>, %arg13: memref<1x1x32xf32, #tpu.memory_space<vmem>>, %arg14: memref<8x32xf32, #tpu.memory_space<vmem>>) attributes {dimension_semantics = [#tpu.dimension_semantics<parallel>, #tpu.dimension_semantics<arbitrary>], iteration_bounds = array<i64: 2, 2>, scalar_prefetch = 0 : i64, scratch_operands = 1 : i64, tpu.core_type = #tpu.core_type<tc>, window_params = [{transform_indices = @transform_0, window_bounds = array<i64: 1, 8, 32>}, {pipeline_mode = #tpu.pipeline_mode<synchronous>, transform_indices = @transform_1, window_bounds = array<i64: 1, 32>}, {pipeline_mode = #tpu.pipeline_mode<synchronous>, transform_indices = @transform_2, window_bounds = array<i64: 1, 32>}, {transform_indices = @transform_3, window_bounds = array<i64: 1, 32, 96>}, {transform_indices = @transform_4, window_bounds = array<i64: 1, 32, 32>}, {transform_indices = @transform_5, window_bounds = array<i64: 1, 32, 64>}, {transform_indices = @transform_6, window_bounds = array<i64: 1, 1, 64>}, {transform_indices = @transform_7, window_bounds = array<i64: 1, 64, 32>}, {transform_indices = @transform_8, window_bounds = array<i64: 1, 9, 32>}, {pipeline_mode = #tpu.pipeline_mode<synchronous>, transform_indices = @transform_9, window_bounds = array<i64: 32, 32>}, {pipeline_mode = #tpu.pipeline_mode<synchronous>, transform_indices = @transform_10, window_bounds = array<i64: 1, 32>}, {transform_indices = @transform_11, window_bounds = array<i64: 1, 1, 32>}]} {
    %c0 = arith.constant 0 : index
    %c0_0 = arith.constant 0 : index
    %c0_1 = arith.constant 0 : index
    %0 = vector.load %arg10[%c0, %c0_0, %c0_1] : memref<1x9x32xf32, #tpu.memory_space<vmem>>, vector<1x9x32xf32>
    %1 = vector.shape_cast %0 : vector<1x9x32xf32> to vector<9x32xf32>
    %c0_i32 = arith.constant 0 : i32
    %2 = arith.cmpi eq, %arg1, %c0_i32 : i32
    %3 = arith.extui %2 : i1 to i32
    %c0_i32_2 = arith.constant 0 : i32
    %4 = arith.cmpi ne, %3, %c0_i32_2 : i32
    scf.if %4 {
      %c0_45 = arith.constant 0 : index
      %c0_46 = arith.constant 0 : index
      %c0_47 = arith.constant 0 : index
      %141 = vector.load %arg2[%c0_45, %c0_46, %c0_47] : memref<1x8x32xbf16, #tpu.memory_space<vmem>>, vector<1x8x32xbf16>
      %142 = vector.shape_cast %141 : vector<1x8x32xbf16> to vector<8x32xbf16>
      %143 = arith.extf %142 : vector<8x32xbf16> to vector<8x32xf32>
      %c0_48 = arith.constant 0 : index
      %c0_49 = arith.constant 0 : index
      %144 = vector.load %arg3[%c0_48, %c0_49] : memref<1x32xf32, #tpu.memory_space<vmem>>, vector<1x32xf32>
      %c0_50 = arith.constant 0 : index
      %c0_51 = arith.constant 0 : index
      %145 = vector.load %arg4[%c0_50, %c0_51] : memref<1x32xf32, #tpu.memory_space<vmem>>, vector<1x32xf32>
      %cst_52 = arith.constant dense<0.000000e+00> : vector<8xf32>
      %146 = vector.multi_reduction <add>, %143, %cst_52 [1] : vector<8x32xf32> to vector<8xf32>
      %147 = vector.shape_cast %146 : vector<8xf32> to vector<8x1xf32>
      %cst_53 = arith.constant 3.200000e+01 : f32
      %148 = vector.broadcast %cst_53 : f32 to vector<8x1xf32>
      %149 = arith.divf %147, %148 : vector<8x1xf32>
      %150 = vector.broadcast %149 : vector<8x1xf32> to vector<8x32xf32>
      %151 = arith.subf %143, %150 : vector<8x32xf32>
      %152 = arith.mulf %151, %151 : vector<8x32xf32>
      %cst_54 = arith.constant dense<0.000000e+00> : vector<8xf32>
      %153 = vector.multi_reduction <add>, %152, %cst_54 [1] : vector<8x32xf32> to vector<8xf32>
      %154 = vector.shape_cast %153 : vector<8xf32> to vector<8x1xf32>
      %cst_55 = arith.constant 3.200000e+01 : f32
      %155 = vector.broadcast %cst_55 : f32 to vector<8x1xf32>
      %156 = arith.divf %154, %155 : vector<8x1xf32>
      %157 = vector.broadcast %149 : vector<8x1xf32> to vector<8x32xf32>
      %158 = arith.subf %143, %157 : vector<8x32xf32>
      %cst_56 = arith.constant 9.99999996E-13 : f32
      %159 = vector.broadcast %cst_56 : f32 to vector<8x1xf32>
      %160 = arith.addf %156, %159 : vector<8x1xf32>
      %161 = math.rsqrt %160 : vector<8x1xf32>
      %162 = vector.broadcast %161 : vector<8x1xf32> to vector<8x32xf32>
      %163 = arith.mulf %158, %162 : vector<8x32xf32>
      %164 = vector.broadcast %144 : vector<1x32xf32> to vector<8x32xf32>
      %165 = arith.mulf %163, %164 : vector<8x32xf32>
      %166 = vector.broadcast %145 : vector<1x32xf32> to vector<8x32xf32>
      %167 = arith.addf %165, %166 : vector<8x32xf32>
      %c0_57 = arith.constant 0 : index
      %c0_58 = arith.constant 0 : index
      %168 = vector.load %arg14[%c0_57, %c0_58] : memref<8x32xf32, #tpu.memory_space<vmem>>, vector<8x32xf32>
      tpu.vector_store %arg14[%c0_57, %c0_58], %167 {strides = array<i32>} : memref<8x32xf32, #tpu.memory_space<vmem>>, vector<8x32xf32>,
    } else {
    }
    %c0_3 = arith.constant 0 : index
    %c0_4 = arith.constant 0 : index
    %5 = vector.load %arg14[%c0_3, %c0_4] : memref<8x32xf32, #tpu.memory_space<vmem>>, vector<8x32xf32>
    %6 = arith.truncf %5 : vector<8x32xf32> to vector<8x32xbf16>
    %c0_5 = arith.constant 0 : index
    %c0_6 = arith.constant 0 : index
    %c0_7 = arith.constant 0 : index
    %7 = vector.load %arg5[%c0_5, %c0_6, %c0_7] : memref<1x32x96xbf16, #tpu.memory_space<vmem>>, vector<1x32x96xbf16>
    %8 = vector.shape_cast %7 : vector<1x32x96xbf16> to vector<32x96xbf16>
    %cst = arith.constant dense<0.000000e+00> : vector<8x96xf32>
    %9 = tpu.matmul %6, %8, %cst {dimension_numbers = #tpu.dot_dimension_numbers<[1], [0], [0], [1], [0, 0, 1, 1], [], []>} : vector<8x32xbf16>, vector<32x96xbf16>, vector<8x96xf32> -> vector<8x96xf32>
    %10 = vector.extract_strided_slice %9 {offsets = [0, 0], sizes = [8, 32], strides = [1, 1]} : vector<8x96xf32> to vector<8x32xf32>
    %11 = vector.extract_strided_slice %1 {offsets = [0, 0], sizes = [1, 32], strides = [1, 1]} : vector<9x32xf32> to vector<1x32xf32>
    %12 = vector.broadcast %11 : vector<1x32xf32> to vector<8x32xf32>
    %13 = arith.addf %10, %12 : vector<8x32xf32>
    %cst_8 = arith.constant 0.353553385 : f32
    %14 = vector.broadcast %cst_8 : f32 to vector<8x32xf32>
    %15 = arith.mulf %13, %14 : vector<8x32xf32>
    %16 = vector.extract_strided_slice %9 {offsets = [0, 32], sizes = [8, 32], strides = [1, 1]} : vector<8x96xf32> to vector<8x32xf32>
    %17 = vector.extract_strided_slice %1 {offsets = [1, 0], sizes = [1, 32], strides = [1, 1]} : vector<9x32xf32> to vector<1x32xf32>
    %18 = vector.broadcast %17 : vector<1x32xf32> to vector<8x32xf32>
    %19 = arith.addf %16, %18 : vector<8x32xf32>
    %20 = vector.extract_strided_slice %9 {offsets = [0, 64], sizes = [8, 32], strides = [1, 1]} : vector<8x96xf32> to vector<8x32xf32>
    %21 = vector.extract_strided_slice %1 {offsets = [2, 0], sizes = [1, 32], strides = [1, 1]} : vector<9x32xf32> to vector<1x32xf32>
    %22 = vector.broadcast %21 : vector<1x32xf32> to vector<8x32xf32>
    %23 = arith.addf %20, %22 : vector<8x32xf32>
    %24 = vector.shape_cast %15 : vector<8x32xf32> to vector<1x8x4x8xf32>
    %25 = tpu.transpose %24, [0, 2, 1, 3] : vector<1x8x4x8xf32> -> vector<1x4x8x8xf32>
    %26 = vector.shape_cast %25 : vector<1x4x8x8xf32> to vector<4x8x8xf32>
    %27 = arith.truncf %26 : vector<4x8x8xf32> to vector<4x8x8xbf16>
    %28 = vector.shape_cast %19 : vector<8x32xf32> to vector<1x8x4x8xf32>
    %29 = tpu.transpose %28, [0, 2, 1, 3] : vector<1x8x4x8xf32> -> vector<1x4x8x8xf32>
    %30 = vector.shape_cast %29 : vector<1x4x8x8xf32> to vector<4x8x8xf32>
    %31 = arith.truncf %30 : vector<4x8x8xf32> to vector<4x8x8xbf16>
    %32 = vector.shape_cast %23 : vector<8x32xf32> to vector<1x8x4x8xf32>
    %33 = tpu.transpose %32, [0, 2, 1, 3] : vector<1x8x4x8xf32> -> vector<1x4x8x8xf32>
    %34 = vector.shape_cast %33 : vector<1x4x8x8xf32> to vector<4x8x8xf32>
    %35 = arith.truncf %34 : vector<4x8x8xf32> to vector<4x8x8xbf16>
    "tpu.trace_start"() <{level = 10 : i32, message = "gqd,gkd->gqk"}> : () -> ()
    %cst_9 = arith.constant dense<0.000000e+00> : vector<4x8x8xf32>
    %36 = tpu.matmul %27, %31, %cst_9 {dimension_numbers = #tpu.dot_dimension_numbers<[2], [2], [1], [1], [0, 0, 0, 1, 1, 1], [0], [0]>} : vector<4x8x8xbf16>, vector<4x8x8xbf16>, vector<4x8x8xf32> -> vector<4x8x8xf32>
    "tpu.trace_stop"() : () -> ()
    %cst_10 = arith.constant dense<0xFF800000> : vector<4x8xf32>
    %37 = vector.multi_reduction <maximumf>, %36, %cst_10 [2] : vector<4x8x8xf32> to vector<4x8xf32>
    %38 = vector.shape_cast %37 : vector<4x8xf32> to vector<4x8x1xf32>
    %39 = vector.broadcast %38 : vector<4x8x1xf32> to vector<4x8x8xf32>
    %40 = arith.subf %36, %39 : vector<4x8x8xf32>
    %41 = math.exp %40 : vector<4x8x8xf32>
    %cst_11 = arith.constant dense<0.000000e+00> : vector<4x8xf32>
    %42 = vector.multi_reduction <add>, %41, %cst_11 [2] : vector<4x8x8xf32> to vector<4x8xf32>
    %43 = vector.shape_cast %42 : vector<4x8xf32> to vector<4x8x1xf32>
    %44 = tpu.reciprocal %43 {approx = true} : vector<4x8x1xf32> -> vector<4x8x1xf32>
    %45 = vector.broadcast %44 : vector<4x8x1xf32> to vector<4x8x8xf32>
    %46 = arith.mulf %41, %45 : vector<4x8x8xf32>
    %47 = arith.truncf %46 : vector<4x8x8xf32> to vector<4x8x8xbf16>
    "tpu.trace_start"() <{level = 10 : i32, message = "gqk,gkd->gqd"}> : () -> ()
    %cst_12 = arith.constant dense<0.000000e+00> : vector<4x8x8xf32>
    %48 = tpu.matmul %47, %35, %cst_12 {dimension_numbers = #tpu.dot_dimension_numbers<[2], [1], [1], [2], [0, 0, 0, 1, 1, 2], [0], [0]>} : vector<4x8x8xbf16>, vector<4x8x8xbf16>, vector<4x8x8xf32> -> vector<4x8x8xf32>
    "tpu.trace_stop"() : () -> ()
    %49 = vector.shape_cast %48 : vector<4x8x8xf32> to vector<1x4x8x8xf32>
    %50 = tpu.transpose %49, [0, 2, 1, 3] : vector<1x4x8x8xf32> -> vector<1x8x4x8xf32>
    %51 = vector.shape_cast %50 : vector<1x8x4x8xf32> to vector<8x32xf32>
    %52 = arith.truncf %51 : vector<8x32xf32> to vector<8x32xbf16>
    %c0_13 = arith.constant 0 : index
    %c0_14 = arith.constant 0 : index
    %c0_15 = arith.constant 0 : index
    %53 = vector.load %arg6[%c0_13, %c0_14, %c0_15] : memref<1x32x32xbf16, #tpu.memory_space<vmem>>, vector<1x32x32xbf16>
    %54 = vector.shape_cast %53 : vector<1x32x32xbf16> to vector<32x32xbf16>
    %cst_16 = arith.constant dense<0.000000e+00> : vector<8x32xf32>
    %55 = tpu.matmul %52, %54, %cst_16 {dimension_numbers = #tpu.dot_dimension_numbers<[1], [0], [0], [1], [0, 0, 1, 1], [], []>} : vector<8x32xbf16>, vector<32x32xbf16>, vector<8x32xf32> -> vector<8x32xf32>
    %56 = vector.extract_strided_slice %1 {offsets = [3, 0], sizes = [1, 32], strides = [1, 1]} : vector<9x32xf32> to vector<1x32xf32>
    %57 = vector.broadcast %56 : vector<1x32xf32> to vector<8x32xf32>
    %58 = arith.addf %55, %57 : vector<8x32xf32>
    %59 = arith.addf %58, %5 : vector<8x32xf32>
    %60 = vector.extract_strided_slice %1 {offsets = [4, 0], sizes = [1, 32], strides = [1, 1]} : vector<9x32xf32> to vector<1x32xf32>
    %61 = vector.extract_strided_slice %1 {offsets = [5, 0], sizes = [1, 32], strides = [1, 1]} : vector<9x32xf32> to vector<1x32xf32>
    %cst_17 = arith.constant dense<0.000000e+00> : vector<8xf32>
    %62 = vector.multi_reduction <add>, %59, %cst_17 [1] : vector<8x32xf32> to vector<8xf32>
    %63 = vector.shape_cast %62 : vector<8xf32> to vector<8x1xf32>
    %cst_18 = arith.constant 3.200000e+01 : f32
    %64 = vector.broadcast %cst_18 : f32 to vector<8x1xf32>
    %65 = arith.divf %63, %64 : vector<8x1xf32>
    %66 = vector.broadcast %65 : vector<8x1xf32> to vector<8x32xf32>
    %67 = arith.subf %59, %66 : vector<8x32xf32>
    %68 = arith.mulf %67, %67 : vector<8x32xf32>
    %cst_19 = arith.constant dense<0.000000e+00> : vector<8xf32>
    %69 = vector.multi_reduction <add>, %68, %cst_19 [1] : vector<8x32xf32> to vector<8xf32>
    %70 = vector.shape_cast %69 : vector<8xf32> to vector<8x1xf32>
    %cst_20 = arith.constant 3.200000e+01 : f32
    %71 = vector.broadcast %cst_20 : f32 to vector<8x1xf32>
    %72 = arith.divf %70, %71 : vector<8x1xf32>
    %73 = vector.broadcast %65 : vector<8x1xf32> to vector<8x32xf32>
    %74 = arith.subf %59, %73 : vector<8x32xf32>
    %cst_21 = arith.constant 9.99999996E-13 : f32
    %75 = vector.broadcast %cst_21 : f32 to vector<8x1xf32>
    %76 = arith.addf %72, %75 : vector<8x1xf32>
    %77 = math.rsqrt %76 : vector<8x1xf32>
    %78 = vector.broadcast %77 : vector<8x1xf32> to vector<8x32xf32>
    %79 = arith.mulf %74, %78 : vector<8x32xf32>
    %80 = vector.broadcast %60 : vector<1x32xf32> to vector<8x32xf32>
    %81 = arith.mulf %79, %80 : vector<8x32xf32>
    %82 = vector.broadcast %61 : vector<1x32xf32> to vector<8x32xf32>
    %83 = arith.addf %81, %82 : vector<8x32xf32>
    %84 = arith.truncf %83 : vector<8x32xf32> to vector<8x32xbf16>
    %c0_22 = arith.constant 0 : index
    %c0_23 = arith.constant 0 : index
    %c0_24 = arith.constant 0 : index
    %85 = vector.load %arg7[%c0_22, %c0_23, %c0_24] : memref<1x32x64xbf16, #tpu.memory_space<vmem>>, vector<1x32x64xbf16>
    %86 = vector.shape_cast %85 : vector<1x32x64xbf16> to vector<32x64xbf16>
    %cst_25 = arith.constant dense<0.000000e+00> : vector<8x64xf32>
    %87 = tpu.matmul %84, %86, %cst_25 {dimension_numbers = #tpu.dot_dimension_numbers<[1], [0], [0], [1], [0, 0, 1, 1], [], []>} : vector<8x32xbf16>, vector<32x64xbf16>, vector<8x64xf32> -> vector<8x64xf32>
    %c0_26 = arith.constant 0 : index
    %c0_27 = arith.constant 0 : index
    %c0_28 = arith.constant 0 : index
    %88 = vector.load %arg8[%c0_26, %c0_27, %c0_28] : memref<1x1x64xf32, #tpu.memory_space<vmem>>, vector<1x1x64xf32>
    %89 = vector.shape_cast %88 : vector<1x1x64xf32> to vector<1x64xf32>
    %90 = vector.broadcast %89 : vector<1x64xf32> to vector<8x64xf32>
    %91 = arith.addf %87, %90 : vector<8x64xf32>
    %cst_29 = arith.constant 5.000000e-01 : f32
    %92 = vector.broadcast %cst_29 : f32 to vector<8x64xf32>
    %93 = arith.mulf %92, %91 : vector<8x64xf32>
    %cst_30 = arith.constant 4.471500e-02 : f32
    %94 = vector.broadcast %cst_30 : f32 to vector<8x64xf32>
    %95 = arith.mulf %94, %91 : vector<8x64xf32>
    %96 = arith.mulf %95, %91 : vector<8x64xf32>
    %97 = arith.mulf %96, %91 : vector<8x64xf32>
    %98 = arith.addf %91, %97 : vector<8x64xf32>
    %cst_31 = arith.constant 0.797884583 : f32
    %99 = vector.broadcast %cst_31 : f32 to vector<8x64xf32>
    %100 = arith.mulf %99, %98 : vector<8x64xf32>
    %101 = math.tanh %100 : vector<8x64xf32>
    %cst_32 = arith.constant 1.000000e+00 : f32
    %102 = vector.broadcast %cst_32 : f32 to vector<8x64xf32>
    %103 = arith.addf %102, %101 : vector<8x64xf32>
    %104 = arith.mulf %93, %103 : vector<8x64xf32>
    %105 = arith.truncf %104 : vector<8x64xf32> to vector<8x64xbf16>
    %c0_33 = arith.constant 0 : index
    %c0_34 = arith.constant 0 : index
    %c0_35 = arith.constant 0 : index
    %106 = vector.load %arg9[%c0_33, %c0_34, %c0_35] : memref<1x64x32xbf16, #tpu.memory_space<vmem>>, vector<1x64x32xbf16>
    %107 = vector.shape_cast %106 : vector<1x64x32xbf16> to vector<64x32xbf16>
    %cst_36 = arith.constant dense<0.000000e+00> : vector<8x32xf32>
    %108 = tpu.matmul %105, %107, %cst_36 {dimension_numbers = #tpu.dot_dimension_numbers<[1], [0], [0], [1], [0, 0, 1, 1], [], []>} : vector<8x64xbf16>, vector<64x32xbf16>, vector<8x32xf32> -> vector<8x32xf32>
    %109 = vector.extract_strided_slice %1 {offsets = [6, 0], sizes = [1, 32], strides = [1, 1]} : vector<9x32xf32> to vector<1x32xf32>
    %110 = vector.broadcast %109 : vector<1x32xf32> to vector<8x32xf32>
    %111 = arith.addf %108, %110 : vector<8x32xf32>
    %112 = arith.addf %111, %83 : vector<8x32xf32>
    %113 = vector.extract_strided_slice %1 {offsets = [7, 0], sizes = [1, 32], strides = [1, 1]} : vector<9x32xf32> to vector<1x32xf32>
    %114 = vector.extract_strided_slice %1 {offsets = [8, 0], sizes = [1, 32], strides = [1, 1]} : vector<9x32xf32> to vector<1x32xf32>
    %cst_37 = arith.constant dense<0.000000e+00> : vector<8xf32>
    %115 = vector.multi_reduction <add>, %112, %cst_37 [1] : vector<8x32xf32> to vector<8xf32>
    %116 = vector.shape_cast %115 : vector<8xf32> to vector<8x1xf32>
    %cst_38 = arith.constant 3.200000e+01 : f32
    %117 = vector.broadcast %cst_38 : f32 to vector<8x1xf32>
    %118 = arith.divf %116, %117 : vector<8x1xf32>
    %119 = vector.broadcast %118 : vector<8x1xf32> to vector<8x32xf32>
    %120 = arith.subf %112, %119 : vector<8x32xf32>
    %121 = arith.mulf %120, %120 : vector<8x32xf32>
    %cst_39 = arith.constant dense<0.000000e+00> : vector<8xf32>
    %122 = vector.multi_reduction <add>, %121, %cst_39 [1] : vector<8x32xf32> to vector<8xf32>
    %123 = vector.shape_cast %122 : vector<8xf32> to vector<8x1xf32>
    %cst_40 = arith.constant 3.200000e+01 : f32
    %124 = vector.broadcast %cst_40 : f32 to vector<8x1xf32>
    %125 = arith.divf %123, %124 : vector<8x1xf32>
    %126 = vector.broadcast %118 : vector<8x1xf32> to vector<8x32xf32>
    %127 = arith.subf %112, %126 : vector<8x32xf32>
    %cst_41 = arith.constant 9.99999996E-13 : f32
    %128 = vector.broadcast %cst_41 : f32 to vector<8x1xf32>
    %129 = arith.addf %125, %128 : vector<8x1xf32>
    %130 = math.rsqrt %129 : vector<8x1xf32>
    %131 = vector.broadcast %130 : vector<8x1xf32> to vector<8x32xf32>
    %132 = arith.mulf %127, %131 : vector<8x32xf32>
    %133 = vector.broadcast %113 : vector<1x32xf32> to vector<8x32xf32>
    %134 = arith.mulf %132, %133 : vector<8x32xf32>
    %135 = vector.broadcast %114 : vector<1x32xf32> to vector<8x32xf32>
    %136 = arith.addf %134, %135 : vector<8x32xf32>
    %c0_42 = arith.constant 0 : index
    %c0_43 = arith.constant 0 : index
    %137 = vector.load %arg14[%c0_42, %c0_43] : memref<8x32xf32, #tpu.memory_space<vmem>>, vector<8x32xf32>
    tpu.vector_store %arg14[%c0_42, %c0_43], %136 {strides = array<i32>} : memref<8x32xf32, #tpu.memory_space<vmem>>, vector<8x32xf32>,
    %c1_i32 = arith.constant 1 : i32
    %138 = arith.cmpi eq, %arg1, %c1_i32 : i32
    %139 = arith.extui %138 : i1 to i32
    %c0_i32_44 = arith.constant 0 : i32
    %140 = arith.cmpi ne, %139, %c0_i32_44 : i32
    scf.if %140 {
      %141 = vector.shape_cast %136 : vector<8x32xf32> to vector<1x8x32xf32>
      %142 = vector.extract_strided_slice %141 {offsets = [0, 0, 0], sizes = [1, 1, 32], strides = [1, 1, 1]} : vector<1x8x32xf32> to vector<1x1x32xf32>
      %143 = vector.shape_cast %142 : vector<1x1x32xf32> to vector<1x32xf32>
      %144 = arith.truncf %143 : vector<1x32xf32> to vector<1x32xbf16>
      %c0_45 = arith.constant 0 : index
      %c0_46 = arith.constant 0 : index
      %145 = vector.load %arg11[%c0_45, %c0_46] : memref<32x32xbf16, #tpu.memory_space<vmem>>, vector<32x32xbf16>
      %cst_47 = arith.constant dense<0.000000e+00> : vector<1x32xf32>
      %146 = tpu.matmul %144, %145, %cst_47 {dimension_numbers = #tpu.dot_dimension_numbers<[1], [0], [0], [1], [0, 0, 1, 1], [], []>} : vector<1x32xbf16>, vector<32x32xbf16>, vector<1x32xf32> -> vector<1x32xf32>
      %c0_48 = arith.constant 0 : index
      %c0_49 = arith.constant 0 : index
      %147 = vector.load %arg12[%c0_48, %c0_49] : memref<1x32xf32, #tpu.memory_space<vmem>>, vector<1x32xf32>
      %148 = arith.addf %146, %147 : vector<1x32xf32>
      %149 = math.tanh %148 : vector<1x32xf32>
      %150 = vector.shape_cast %149 : vector<1x32xf32> to vector<1x1x32xf32>
      %c0_50 = arith.constant 0 : index
      %c0_51 = arith.constant 0 : index
      %c0_52 = arith.constant 0 : index
      %151 = vector.load %arg13[%c0_50, %c0_51, %c0_52] : memref<1x1x32xf32, #tpu.memory_space<vmem>>, vector<1x1x32xf32>
      tpu.vector_store %arg13[%c0_50, %c0_51, %c0_52], %150 {strides = array<i32>} : memref<1x1x32xf32, #tpu.memory_space<vmem>>, vector<1x1x32xf32>,
    } else {
    }
    return
  }
  func.func @transform_0(%arg0: i32, %arg1: i32) -> (i32, i32, i32) {
    %c0_i32 = arith.constant 0 : i32
    %c0_i32_0 = arith.constant 0 : i32
    %c0_i32_1 = arith.constant 0 : i32
    return %arg0, %c0_i32, %c0_i32_0 : i32, i32, i32
  }
  func.func @transform_1(%arg0: i32, %arg1: i32) -> (i32, i32) {
    %c0_i32 = arith.constant 0 : i32
    %c0_i32_0 = arith.constant 0 : i32
    %c0_i32_1 = arith.constant 0 : i32
    return %c0_i32, %c0_i32_0 : i32, i32
  }
  func.func @transform_2(%arg0: i32, %arg1: i32) -> (i32, i32) {
    %c0_i32 = arith.constant 0 : i32
    %c0_i32_0 = arith.constant 0 : i32
    %c0_i32_1 = arith.constant 0 : i32
    return %c0_i32, %c0_i32_0 : i32, i32
  }
  func.func @transform_3(%arg0: i32, %arg1: i32) -> (i32, i32, i32) {
    %c0_i32 = arith.constant 0 : i32
    %c0_i32_0 = arith.constant 0 : i32
    %c0_i32_1 = arith.constant 0 : i32
    return %arg1, %c0_i32, %c0_i32_0 : i32, i32, i32
  }
  func.func @transform_4(%arg0: i32, %arg1: i32) -> (i32, i32, i32) {
    %c0_i32 = arith.constant 0 : i32
    %c0_i32_0 = arith.constant 0 : i32
    %c0_i32_1 = arith.constant 0 : i32
    return %arg1, %c0_i32, %c0_i32_0 : i32, i32, i32
  }
  func.func @transform_5(%arg0: i32, %arg1: i32) -> (i32, i32, i32) {
    %c0_i32 = arith.constant 0 : i32
    %c0_i32_0 = arith.constant 0 : i32
    %c0_i32_1 = arith.constant 0 : i32
    return %arg1, %c0_i32, %c0_i32_0 : i32, i32, i32
  }
  func.func @transform_6(%arg0: i32, %arg1: i32) -> (i32, i32, i32) {
    %c0_i32 = arith.constant 0 : i32
    %c0_i32_0 = arith.constant 0 : i32
    %c0_i32_1 = arith.constant 0 : i32
    return %arg1, %c0_i32, %c0_i32_0 : i32, i32, i32
  }
  func.func @transform_7(%arg0: i32, %arg1: i32) -> (i32, i32, i32) {
    %c0_i32 = arith.constant 0 : i32
    %c0_i32_0 = arith.constant 0 : i32
    %c0_i32_1 = arith.constant 0 : i32
    return %arg1, %c0_i32, %c0_i32_0 : i32, i32, i32
  }
  func.func @transform_8(%arg0: i32, %arg1: i32) -> (i32, i32, i32) {
    %c0_i32 = arith.constant 0 : i32
    %c0_i32_0 = arith.constant 0 : i32
    %c0_i32_1 = arith.constant 0 : i32
    return %arg1, %c0_i32, %c0_i32_0 : i32, i32, i32
  }
  func.func @transform_9(%arg0: i32, %arg1: i32) -> (i32, i32) {
    %c0_i32 = arith.constant 0 : i32
    %c0_i32_0 = arith.constant 0 : i32
    %c0_i32_1 = arith.constant 0 : i32
    return %c0_i32, %c0_i32_0 : i32, i32
  }
  func.func @transform_10(%arg0: i32, %arg1: i32) -> (i32, i32) {
    %c0_i32 = arith.constant 0 : i32
    %c0_i32_0 = arith.constant 0 : i32
    %c0_i32_1 = arith.constant 0 : i32
    return %c0_i32, %c0_i32_0 : i32, i32
  }
  func.func @transform_11(%arg0: i32, %arg1: i32) -> (i32, i32, i32) {
    %c0_i32 = arith.constant 0 : i32
    %c0_i32_0 = arith.constant 0 : i32
    %c0_i32_1 = arith.constant 0 : i32
    return %arg0, %c0_i32, %c0_i32_0 : i32, i32, i32
  }
}

</mosaic_0001>

<bundles_post_ra>
// kernel: tpu_custom_call.1
= control target key start
LH: loop header
LB: loop body
LE: loop exit
PB: predicated region body
PF: predicated region fallthrough
CT: control target
= control target key end

     0   :  { %s3052_s0 = inlined_call_operand.vmem [shape: bf16[2,8,32], index: 0, kind: input, shape index: {}]   ;;  %s3053_s1 = inlined_call_operand.vmem [shape: f32[1,32], index: 1, kind: input, shape index: {}]   ;;  %s3054_s2 = inlined_call_operand.vmem [shape: f32[1,32], index: 2, kind: input, shape index: {}]   ;;  %s3055_s3 = inlined_call_operand.vmem [shape: bf16[2,32,96], index: 3, kind: input, shape index: {}]   ;;  %s3056_s4 = inlined_call_operand.vmem [shape: bf16[2,32,32], index: 4, kind: input, shape index: {}]   ;;  %s3057_s5 = inlined_call_operand.vmem [shape: bf16[2,32,64], index: 5, kind: input, shape index: {}]   ;;  %s3058_s6 = inlined_call_operand.vmem [shape: f32[2,1,64], index: 6, kind: input, shape index: {}]   ;;  %s3059_s7 = inlined_call_operand.vmem [shape: bf16[2,64,32], index: 7, kind: input, shape index: {}]   ;;  %s3060_s8 = inlined_call_operand.vmem [shape: f32[2,9,32], index: 8, kind: input, shape index: {}]   ;;  %s3061_s9 = inlined_call_operand.vmem [shape: bf16[32,32], index: 9, kind: input, shape index: {}]   ;;  %s3062_s10 = inlined_call_operand.vmem [shape: f32[1,32], index: 10, kind: input, shape index: {}]   ;;  %s3063_s11 = inlined_call_operand.hbm [shape: f32[2,1,32], index: 11, kind: output, shape index: {}]  }
   0x1   :  { %3075 = sst [smem:[#allocation16_spill]] %s3052_s0 }
   0x2   :  { %3076 = sst [smem:[#allocation17_spill]] %s3055_s3 }
   0x3   :  { %3077 = sst [smem:[#allocation18_spill]] %s3063_s11 }
   0x4   :  { %16 = vsyncpa [#allocation4], 0 }
   0x5   :  { %18 = vsyncpa [#allocation4 + $0x1], 0  ;;  %s2642_s17 = smov 0   ;;  %s2644_s18 = smov 0  }
   0x6   :  { %s2646_s19 = smov 0   ;;  %s2648_s20 = smov 0  }
   0x7   :  { %s2650_s21 = smov 0   ;;  %s2652_s22 = smov 0  }
   0x8   :  { %s2654_s23 = smov 0   ;;  %s2656_s24 = smov 0  }
   0x9 LB: > { %3078 = sst [smem:[#allocation6_spill]] %s2536_s17  ;;  %s2160_s25 = sadd.s32 4294967295, %s2564_s24   ;;  %s2564_s24 = sphi %s2656_s24, %s24_s24   ;;  %s2560_s23 = sphi %s2654_s23, %s3104_s23   ;;  %s2556_s22 = sphi %s2652_s22, %s3103_s22   ;;  %s2552_s21 = sphi %s2650_s21, %s3102_s21   ;;  %s2548_s20 = sphi %s2648_s20, %s3101_s20   ;;  %s2544_s19 = sphi %s2646_s19, %s3100_s19   ;;  %s2540_s18 = sphi %s2644_s18, %s3106_s18   ;;  %s2536_s17 = sphi %s2642_s17, %s3105_s17  }
   0xa   : > { %3079 = sst [smem:[#allocation7_spill]] %s2544_s19  ;;  %s2161_s26 = sadd.s32 4294967294, %s2564_s24  }
   0xb   : > { %3080 = sst [smem:[#allocation8_spill]] %s2556_s22  ;;  %s33_s27 = sadd.s32 1, %s2556_s22 }
   0xc   : > { %3081 = sst [smem:[#allocation9_spill]] %s2560_s23  ;;  %p34_p0 = scmp.ge.s32.totalorder %s33_s27, 2 }
   0xd   : > { %3082 = sst [smem:[#allocation10_spill]] %s2564_s24  ;;  %s36_s28 = sadd.s32 1, %s2560_s23 }
   0xe   : > { %p319_p1 = scmp.ne.s32.totalorder %s2544_s19, %s2540_s18  ;;  %p320_p2 = scmp.eq.s32.totalorder %s2160_s25, 3 }
   0xf   : > { %s3108_s27 = smov (%p34_p0, %s33_s27), 0  ;;  %s3110_s28 = smov (!%p34_p0, %s36_s28), %s2560_s23 }
  0x10   : > { %3083 = sst [smem:[#allocation11_spill]] %s3108_s27  ;;  %p2691_p3 = por %p320_p2, %p319_p1 }
  0x11   : > { %p325_p4 = scmp.ne.s32.totalorder %s2540_s18, %s2536_s17  ;;  %p38_p5 = scmp.ge.s32.totalorder %s3110_s28, 2 }
  0x12   : > { %s3084_s29 = scalar_select %p2691_p3, 1, 0 }
  0x13   : > { %p326_p6 = scmp.eq.s32.totalorder %s2161_s26, 3  ;;  %p2164_p7 = scmp.ge.s32.totalorder %s2564_s24, 1 }
  0x14   : > { %3085 = sst [smem:[#allocation12_spill]] %s3084_s29  ;;  %p409_p8 = scmp.lt.s32.totalorder %s2564_s24, 5 }
  0x15   : > { %s3112_s28 = smov (%p38_p5, %s3110_s28), 0  ;;  %p2701_p9 = por %p326_p6, %p325_p4 }
  0x16   : > { %3086 = sst [smem:[#allocation13_spill]] %s3112_s28  ;;  %p410_p10 = pnand %p2164_p7, %p409_p8 }
  0x17   : > { %s3087_s30 = scalar_select %p2701_p9, 1, 0 }
  0x18   : > { %s306_s12 = ssub.s32 %s2560_s23, %s3112_s28  ;;  %s309_s13 = sadd.s32 1, %s2544_s19 }
  0x19   : > { %3088 = sst [smem:[#allocation14_spill]] %s3087_s30  ;;  %p307_p11 = scmp.eq.s32.totalorder %s306_s12, 0 }
  0x1a   : > { %413 = sbr.rel (%p410_p10) target bundleno = 3199 (0xc7f), region = 64  ;;  %p475_p12 = scmp.lt.s32.totalorder (!%p410_p10), %s2552_s21, 1 }
  0x1b   : > { %s2709_s14 = scalar_select %p307_p11, %s2544_s19, %s309_s13  }
  0x1c   : > { %p479_p13 = scmp.lt.s32.totalorder (!%p410_p10), %s2548_s20, 1  ;;  %s3090_s0 = sld [smem:[#allocation16_spill]] (!%p410_p10) }
  0x1d   : > { %3089 = sst [smem:[#allocation15_spill]] %s2709_s14  ;;  %s3092_s17 = sand.u32 (!%p410_p10), 1, %s2540_s18  }
  0x1e   : > { %s3091_s3 = sld [smem:[#allocation17_spill]] (!%p410_p10)  ;;  %s2756_s24 = scalar_lea.vmem (!%p410_p10), [#allocation3], %s3092_s17 }
  0x1f   : > { %s476_s16 = scalar_select %p475_p12, %s2552_s21, 1 }
  0x20   : > { %s2716_s25 = scalar_select %p479_p13, %s2548_s20, 1 }
  0x21   : > { %s2165_s26 = sshll.u32 %s476_s16, 2  ;;  %p2176_p0 = scmp.ne.s32.totalorder %s2548_s20, 0 }
  0x22   : > { %s478_s28 = scalar_lea.vmem %s3090_s0, %s2165_s26  ;;  %s2218_s27 = sshll.u32 %s2716_s25, 4 }
  0x23   : > { %s2730_s30 = scalar_lea.vmem %s3056_s4, %s2218_s27  ;;  %s2735_s11 = scalar_lea.vmem %s3057_s5, %s2218_s27 }
  0x24   : > { %s2725_s14 = scalar_lea.vmem %s3091_s3, %s2218_s27  ;;  %s496_s26 = scalar_lea.vmem %s3058_s6, %s2716_s25 }
  0x25   : > { %s2221_s12 = sshll.u32 %s2716_s25, 5  ;;  %s506_s22 = scalar_lea.vmem %s3060_s8, %s2218_s27 }
  0x26   : > { %s2748_s19 = scalar_lea.vmem %s3059_s7, %s2221_s12  ;;  %v2750_v0 = vld [vmem:[%s506_s22] sm:$0xff]  ;;  %v2752_v1 = vld [vmem:[%s506_s22 + $0x8] ss:$0 sm:$0xff]  ;;  %513 = sbr.rel (%p2176_p0) target bundleno = 355 (0x163), region = 68 }
  0x2b   : > { %v514_v2 = vld [vmem:[%s478_s28] sm:$0xf]  ;;  %vm518_vm0 = vcmask 261120  }
  0x2c   : > { %v515_v3 = vunpack.c.l.bf16 %v514_v2  ;;  %v2177_v14 = vld [vmem:[%s3053_s1] ss:$0 sm:$0xff] }
  0x2d   : > { %v2178_v16 = vld [vmem:[%s3054_s2] ss:$0 sm:$0xff] }
  0x2e   : > { %v519_v4 = vsel %vm518_vm0, %v515_v3, 0.0 }
  0x2f   : > { %520 = vadd.xlane.f32.xlu0 %v519_v4 }
  0xb8   : > { %v521_v5 = vpop.xlane.xlu0 %520 }
  0xb9   : > { %v523_v6 = vmul.f32 0.03125, %v521_v5 }
  0xbb   : > { %v524_v7 = vsub.f32 %v515_v3, %v523_v6 }
  0xbd   : > { %v525_v8 = vmul.f32 %v524_v7, %v524_v7 }
  0xbf   : > { %v526_v9 = vsel %vm518_vm0, %v525_v8, 0.0 }
  0xc0   : > { %527 = vadd.xlane.f32.xlu0 %v526_v9 }
 0x149   : > { %v528_v10 = vpop.xlane.xlu0 %527 }
 0x14a   : > { %v529_v11 = vmul.f32 0.03125, %v528_v10 }
 0x14c   : > { %v530_v12 = vadd.f32 1e-12, %v529_v11 }
 0x14e   : > { %2434 = vrsqrt.f32 %v530_v12 }
 0x15b   : > { %v2435_v13 = vpop.eup %2434 }
 0x15c   : > { %v532_v15 = vmul.f32 %v2435_v13, %v524_v7 }
 0x15e   : > { %v539_v17 = vmul.f32 %v2177_v14, %v532_v15 }
 0x160   : > { %v546_v18 = vadd.f32 %v2178_v16, %v539_v17 }
 0x162   : > { %547 = vst.msk [vmem:[#allocation2] sm:$0xff] %vm518_vm0, %v546_v18 }
 0x163 PF: > { %v2436_v19 = vld [vmem:[%s2725_s14 + $0x8] sm:$0xff]   ;;  %v610_v20 = vlaneseq  ;;  %v2566_v21 = vmov 0.0   ;;  %v2437_v22 = vld [vmem:[%s2725_s14] sm:$0xff]   ;;  %vm2567_vm1 = vmmov 0   ;;  %vm566_vm2 = vcmask 261120   ;;  %s2568_s29 = smov 32  }
 0x164   : > { %2256 = vmatprep.subr.bf16.mxu0 %v2566_v21  ;;  %2264 = vmatprep.subr.bf16.mxu1 %v2566_v21  ;;  %s2569_s14 = smov 112   ;;  %s2570_s15 = smov 120   ;;  %v2574_v43 = vmov 1983009808   ;;  %v2575_v46 = vmov 1934713408  }
 0x165   : > { %2257 = vmatpush3.bf16.msra.mxu0 %v2436_v19  ;;  %2260 = vmatprep.mubr.msk.bf16.mxu0 %vm2567_vm1, %v2566_v21  ;;  %v2776_v24 = vshrl.u32 %v610_v20, 7  ;;  %s2571_s16 = smov 104   ;;  %s2572_s12 = smov 96   ;;  %v647_v44 = vunpack.c.l.s4 %v2574_v43  ;;  %v679_v47 = vunpack.c.l.s4 %v2575_v46  ;;  %vm1102_vm3 = vcmask 64512  }
 0x166   : > { %2258 = vmatprep.subr.bf16.mxu0 %v2566_v21  ;;  %2266 = vmatprep.mubr.msk.bf16.mxu1 %vm2567_vm1, %v2566_v21  ;;  %s2573_s13 = smov 64   ;;  %vm1338_vm4 = vcmask 1043456   ;;  %s2577_s22 = smov 8   ;;  %vm1669_vm5 = vcmask 130048   ;;  %vm1671_vm6 = vcmask 195584   ;;  %vm1875_vm7 = vcmask 523264  }
 0x167   : > { %v618_v25 = vsub.s32 1, %v2776_v24  ;;  %v612_v34 = vsub.s32 0, %v2776_v24  ;;  %v627_v41 = vsub.s32 2, %v2776_v24  ;;  %v648_v48 = vunpack.c.0.s8 %v647_v44  ;;  %s2578_s23 = smov 24   ;;  %p2211_p1 = scmp.ne.s32.totalorder %s2548_s20, 1 }
 0x168   : > { %v680_v51 = vunpack.c.0.s8 %v679_v47 }
 0x169   : > { %v2774_v23 = vld [vmem:[#allocation2] sm:$0xff]  ;;  %2259 = vmatpush3.bf16.msra.mxu0 %v2437_v22  ;;  %v619_v27 = vrot.slane %v2750_v0, %v618_v25  ;;  %v613_v35 = vrot.slane %v2750_v0, %v612_v34  ;;  %v628_v42 = vrot.slane %v2750_v0, %v627_v41  ;;  %v2805_v52 = vsub.s32 %v648_v48, %v2776_v24 }
 0x16a   : > { %v549_v26 = vpack.c.bf16 %v2774_v23, %v2774_v23  ;;  %2270 = vmatprep.subr.bf16.mxu0 %v2566_v21  ;;  %v2808_v59 = vsub.s32 %v680_v51, %v2776_v24 }
 0x16b   : > { %621 = vrot.lane.b32.xlu0 %v619_v27, %s2568_s29 }
 0x16c   : > { %2261 = vmatmul.mubr.msk.bf16.vlgmr.msra.gmra.mxu0 %vm566_vm2, %v549_v26 }
 0x16d   : > { %2272 = vmatprep.mubr.msk.bf16.mxu0 %vm2567_vm1, %v2566_v21 }
 0x1dd   : > { %v622_v28 = vpop.permute.xlu0 %621 }
 0x22c   : > { %v2789_v29 = vpop.f32.mrf.mxu0 }
 0x22d   : > { %v624_v30 = vadd.f32 %v622_v28, %v2789_v29  ;;  %v614_v36 = vadd.f32 %v613_v35, %v2789_v29 }
 0x22e   : > { %v2262_v31 = vpop.f32.mrf.mxu0 }
 0x22f   : > { %787 = vrot.lane.b32.xlu1 %v624_v30, %s2569_s14  ;;  %785 = vrot.lane.b32.xlu0 %v624_v30, %s2570_s15  ;;  %v615_v39 = vmul.f32 0.35355338, %v614_v36 }
 0x230   : > { %v607_v32 = vpop.f32.mrf.mxu0 }
 0x232   : > { %v2263_v33 = vpop.f32.mrf.mxu0 }
 0x233   : > { %789 = vrot.lane.b32.xlu1 %v624_v30, %s2571_s16  ;;  %791 = vrot.lane.b32.xlu0 %v624_v30, %s2572_s12 }
 0x2a1   : > { %v788_v37 = vpop.permute.xlu1 %787  ;;  %v786_v38 = vpop.permute.xlu0 %785 }
 0x2a2   : > { %795 = vrot.lane.b32.xlu0 %v788_v37, %s2572_s12  ;;  %793 = vrot.lane.b32.xlu1 %v786_v38, %s2572_s12 }
 0x2a5   : > { %v790_v40 = vpop.permute.xlu1 %789  ;;  %v792_v45 = vpop.permute.xlu0 %791 }
 0x2a6   : > { %797 = vrot.lane.b32.xlu1 %v790_v40, %s2572_s12  ;;  %635 = vrot.lane.b32.xlu0 %v615_v39, %s2570_s15 }
 0x2aa   : > { %638 = vrot.lane.b32.xlu1 %v615_v39, %s2569_s14  ;;  %641 = vrot.lane.b32.xlu0 %v615_v39, %s2571_s16 }
 0x2ae   : > { %630 = vrot.lane.b32.xlu1 %v628_v42, %s2573_s13 }
 0x314   : > { %v794_v49 = vpop.permute.xlu1 %793  ;;  %v796_v50 = vpop.permute.xlu0 %795 }
 0x315   : > { %v803_v53 = vcombine.low %v792_v45, %v796_v50  ;;  %v804_v54 = vcombine.high %v792_v45, %v796_v50 }
 0x317   : > { %v811_v60 = vrot.slane %v803_v53, %v2805_v52  ;;  %v818_v61 = vrot.slane %v804_v54, %v2805_v52 }
 0x318   : > { %v798_v55 = vpop.permute.xlu1 %797  ;;  %v636_v56 = vpop.permute.xlu0 %635 }
 0x319   : > { %v819_v57 = vcombine.low %v794_v49, %v798_v55  ;;  %v820_v58 = vcombine.high %v794_v49, %v798_v55 }
 0x31b   : > { %v827_v62 = vrot.slane %v819_v57, %v2805_v52  ;;  %v834_v63 = vrot.slane %v820_v58, %v2805_v52 }
 0x31c   : > { %v639_v2 = vpop.permute.xlu1 %638  ;;  %v642_v3 = vpop.permute.xlu0 %641 }
 0x31d   : > { %v835_v4 = vcombine.low %v811_v60, %v827_v62  ;;  %v836_v5 = vcombine.high %v811_v60, %v827_v62  ;;  %v851_v6 = vcombine.low %v818_v61, %v834_v63  ;;  %v852_v7 = vcombine.high %v818_v61, %v834_v63 }
 0x31e   : > { %v644_v8 = vcombine.low %v615_v39, %v639_v2  ;;  %v645_v9 = vcombine.high %v615_v39, %v639_v2  ;;  %v660_v10 = vcombine.low %v636_v56, %v642_v3  ;;  %v661_v11 = vcombine.high %v636_v56, %v642_v3 }
 0x31f   : > { %v843_v12 = vrot.slane %v835_v4, %v2808_v59  ;;  %v850_v13 = vrot.slane %v836_v5, %v2808_v59  ;;  %v859_v14 = vrot.slane %v851_v6, %v2808_v59  ;;  %v866_v15 = vrot.slane %v852_v7, %v2808_v59 }
 0x320   : > { %v652_v16 = vrot.slane %v644_v8, %v2805_v52  ;;  %v659_v17 = vrot.slane %v645_v9, %v2805_v52  ;;  %v668_v18 = vrot.slane %v660_v10, %v2805_v52  ;;  %v675_v19 = vrot.slane %v661_v11, %v2805_v52  ;;  %v631_v20 = vpop.permute.xlu1 %630 }
 0x321   : > { %v871_v22 = vcombine.low %v843_v12, %v850_v13  ;;  %v2184_v25 = vcombine.high %v843_v12, %v850_v13  ;;  %v887_v26 = vcombine.low %v859_v14, %v866_v15  ;;  %v2185_v27 = vcombine.high %v859_v14, %v866_v15 }
 0x322   : > { %v676_v28 = vcombine.low %v652_v16, %v668_v18  ;;  %v677_v30 = vcombine.high %v652_v16, %v668_v18  ;;  %v692_v31 = vcombine.low %v659_v17, %v675_v19  ;;  %v693_v32 = vcombine.high %v659_v17, %v675_v19 }
 0x323   : > { %v2823_v33 = vadd.f32 %v631_v20, %v2789_v29  ;;  %v878_v34 = vrot.slane %v871_v22, %v2805_v52  ;;  %v886_v35 = vrot.slane %v2184_v25, %v2805_v52  ;;  %v894_v36 = vrot.slane %v887_v26, %v2805_v52 }
 0x324   : > { %v684_v37 = vrot.slane %v676_v28, %v2808_v59  ;;  %v691_v38 = vrot.slane %v677_v30, %v2808_v59  ;;  %v700_v39 = vrot.slane %v692_v31, %v2808_v59  ;;  %v707_v40 = vrot.slane %v693_v32, %v2808_v59 }
 0x325   : > { %944 = vrot.lane.b32.xlu1 %v2823_v33, %s2570_s15  ;;  %946 = vrot.lane.b32.xlu0 %v2823_v33, %s2569_s14  ;;  %v902_v29 = vrot.slane %v2185_v27, %v2805_v52  ;;  %v903_v41 = vcombine.low %v878_v34, %v886_v35  ;;  %v904_v48 = vcombine.high %v878_v34, %v886_v35 }
 0x326   : > { %v712_v42 = vcombine.low %v684_v37, %v691_v38  ;;  %v2182_v43 = vcombine.high %v684_v37, %v691_v38  ;;  %v728_v44 = vcombine.low %v700_v39, %v707_v40  ;;  %v2183_v45 = vcombine.high %v700_v39, %v707_v40 }
 0x327   : > { %v911_v46 = vrot.slane %v903_v41, %v2808_v59  ;;  %v919_v47 = vcombine.low %v894_v36, %v902_v29  ;;  %v920_v49 = vcombine.high %v894_v36, %v902_v29  ;;  %v918_v61 = vrot.slane %v904_v48, %v2808_v59 }
 0x328   : > { %v719_v50 = vrot.slane %v712_v42, %v2805_v52  ;;  %v727_v51 = vrot.slane %v2182_v43, %v2805_v52  ;;  %v735_v53 = vrot.slane %v728_v44, %v2805_v52  ;;  %v743_v54 = vrot.slane %v2183_v45, %v2805_v52 }
 0x329   : > { %948 = vrot.lane.b32.xlu1 %v2823_v33, %s2571_s16  ;;  %v927_v55 = vrot.slane %v919_v47, %v2808_v59  ;;  %v934_v62 = vrot.slane %v920_v49, %v2808_v59 }
 0x32a   : > { %v744_v56 = vcombine.low %v719_v50, %v727_v51  ;;  %v760_v57 = vcombine.low %v735_v53, %v743_v54  ;;  %v745_v9 = vcombine.high %v719_v50, %v727_v51  ;;  %v761_v10 = vcombine.high %v735_v53, %v743_v54 }
 0x32b   : > { %v935_v58 = vcombine.low %v911_v46, %v927_v55  ;;  %v936_v60 = vcombine.high %v911_v46, %v927_v55  ;;  %v937_v7 = vcombine.low %v918_v61, %v934_v62  ;;  %v938_v8 = vcombine.high %v918_v61, %v934_v62 }
 0x32c   : > { %v752_v3 = vrot.slane %v744_v56, %v2808_v59  ;;  %v768_v4 = vrot.slane %v760_v57, %v2808_v59  ;;  %v759_v17 = vrot.slane %v745_v9, %v2808_v59  ;;  %v775_v18 = vrot.slane %v761_v10, %v2808_v59 }
 0x32d   : > { %v939_v63 = vpack.c.bf16 %v935_v58, %v935_v58  ;;  %v940_v2 = vpack.c.bf16 %v936_v60, %v936_v60  ;;  %v941_v13 = vpack.c.bf16 %v937_v7, %v937_v7  ;;  %v942_v14 = vpack.c.bf16 %v938_v8, %v938_v8 }
 0x32e   : > { %v776_v11 = vcombine.low %v752_v3, %v768_v4  ;;  %v777_v12 = vcombine.high %v752_v3, %v768_v4  ;;  %v778_v22 = vcombine.low %v759_v17, %v775_v18  ;;  %v779_v25 = vcombine.high %v759_v17, %v775_v18 }
 0x32f   : > { %v1107_v5 = vsel %vm1102_vm3, %v939_v63, 0  ;;  %v1153_v6 = vsel %vm1102_vm3, %v940_v2, 0  ;;  %v1199_v19 = vsel %vm1102_vm3, %v941_v13, 0  ;;  %v1245_v20 = vsel %vm1102_vm3, %v942_v14, 0 }
 0x330   : > { %2265 = vmatpush3.bf16.xpose.msra.mxu1 %v1107_v5  ;;  %2271 = vmatpush3.bf16.xpose.msra.mxu0 %v1153_v6  ;;  %v780_v15 = vpack.c.bf16 %v776_v11, %v776_v11  ;;  %v781_v16 = vpack.c.bf16 %v777_v12, %v777_v12  ;;  %v782_v26 = vpack.c.bf16 %v778_v22, %v778_v22 }
 0x331   : > { %2276 = vmatprep.subr.bf16.mxu1 %v2566_v21  ;;  %2282 = vmatprep.subr.bf16.mxu0 %v2566_v21  ;;  %v783_v27 = vpack.c.bf16 %v779_v25, %v779_v25 }
 0x337   : > { %2267 = vmatmul.mubr.msk.bf16.vlgmr.msra.gmra.mxu1 %vm1102_vm3, %v780_v15  ;;  %2273 = vmatmul.mubr.msk.bf16.vlgmr.msra.gmra.mxu0 %vm1102_vm3, %v781_v16 }
 0x338   : > { %2277 = vmatpush3.bf16.xpose.msra.mxu1 %v1199_v19  ;;  %2283 = vmatpush3.bf16.xpose.msra.mxu0 %v1245_v20 }
 0x339   : > { %2278 = vmatprep.mubr.msk.bf16.mxu1 %vm2567_vm1, %v2566_v21  ;;  %2284 = vmatprep.mubr.msk.bf16.mxu0 %vm2567_vm1, %v2566_v21 }
 0x33a   : > { %2288 = vmatprep.subr.bf16.mxu1 %v2566_v21  ;;  %2294 = vmatprep.subr.bf16.mxu0 %v2566_v21 }
 0x33f   : > { %2279 = vmatmul.mubr.msk.bf16.vlgmr.msra.gmra.mxu1 %vm1102_vm3, %v782_v26  ;;  %2285 = vmatmul.mubr.msk.bf16.vlgmr.msra.gmra.mxu0 %vm1102_vm3, %v783_v27 }
 0x340   : > { %2290 = vmatprep.mubr.msk.bf16.mxu1 %vm2567_vm1, %v2566_v21  ;;  %2296 = vmatprep.mubr.msk.bf16.mxu0 %vm2567_vm1, %v2566_v21 }
 0x397   : > { %v945_v49 = vpop.permute.xlu1 %944  ;;  %v947_v50 = vpop.permute.xlu0 %946 }
 0x39b   : > { %v949_v51 = vpop.permute.xlu1 %948 }
 0x3f7   : > { %v1143_v28 = vpop.f32.mrf.mxu1  ;;  %v1189_v30 = vpop.f32.mrf.mxu0 }
 0x3f8   : > { %v1287_v31 = vsel %vm1102_vm3, %v1143_v28, -inf  ;;  %v1290_v32 = vsel %vm1102_vm3, %v1189_v30, -inf }
 0x3f9   : > { %1288 = vmax.xlane.f32.xlu0 %v1287_v31  ;;  %v2268_v34 = vpop.f32.mrf.mxu1  ;;  %1291 = vmax.xlane.f32.xlu1 %v1290_v32  ;;  %v2274_v35 = vpop.f32.mrf.mxu0 }
 0x3fb   : > { %v1146_v36 = vpop.f32.mrf.mxu1  ;;  %v1192_v37 = vpop.f32.mrf.mxu0 }
 0x3fd   : > { %v2269_v38 = vpop.f32.mrf.mxu1  ;;  %v2275_v39 = vpop.f32.mrf.mxu0 }
 0x3ff   : > { %v1235_v40 = vpop.f32.mrf.mxu1  ;;  %v1281_v29 = vpop.f32.mrf.mxu0 }
 0x400   : > { %v1293_v41 = vsel %vm1102_vm3, %v1235_v40, -inf  ;;  %v1296_v46 = vsel %vm1102_vm3, %v1281_v29, -inf }
 0x401   : > { %1294 = vmax.xlane.f32.xlu0 %v1293_v41  ;;  %v2280_v42 = vpop.f32.mrf.mxu1  ;;  %v2286_v43 = vpop.f32.mrf.mxu0 }
 0x403   : > { %v1238_v44 = vpop.f32.mrf.mxu1  ;;  %v1284_v45 = vpop.f32.mrf.mxu0 }
 0x405   : > { %v2281_v47 = vpop.f32.mrf.mxu1  ;;  %1297 = vmax.xlane.f32.xlu0 %v1296_v46  ;;  %v2287_v48 = vpop.f32.mrf.mxu0 }
 0x40a   : > { %952 = vrot.lane.b32.xlu1 %v945_v49, %s2573_s13 }
 0x41b   : > { %950 = vrot.lane.b32.xlu0 %v2823_v33, %s2573_s13 }
 0x482   : > { %v1289_v53 = vpop.xlane.xlu0 %1288  ;;  %v1292_v54 = vpop.xlane.xlu1 %1291 }
 0x483   : > { %v1299_v55 = vsub.f32 %v1143_v28, %v1289_v53  ;;  %v1300_v56 = vsub.f32 %v1189_v30, %v1292_v54 }
 0x485   : > { %v1303_v57 = vmul.f32 1.442695, %v1299_v55  ;;  %v1305_v58 = vmul.f32 1.442695, %v1300_v56 }
 0x486   : > { %v953_v11 = vpop.permute.xlu1 %952 }
 0x487   : > { %2446 = vpow2.f32 %v1303_v57 }
 0x488   : > { %2448 = vpow2.f32 %v1305_v58 }
 0x48a   : > { %v1295_v63 = vpop.xlane.xlu0 %1294 }
 0x48b   : > { %v1301_v3 = vsub.f32 %v1235_v40, %v1295_v63 }
 0x48d   : > { %v1307_v5 = vmul.f32 1.442695, %v1301_v3 }
 0x48e   : > { %v1298_v2 = vpop.xlane.xlu0 %1297 }
 0x48f   : > { %v1302_v4 = vsub.f32 %v1281_v29, %v1298_v2  ;;  %2450 = vpow2.f32 %v1307_v5 }
 0x491   : > { %v1309_v6 = vmul.f32 1.442695, %v1302_v4 }
 0x492   : > { %v951_v12 = vpop.permute.xlu0 %950 }
 0x493   : > { %2452 = vpow2.f32 %v1309_v6 }
 0x494   : > { %v2878_v60 = vpop.eup %2446 }
 0x495   : > { %v2880_v61 = vpop.eup %2448  ;;  %v1311_v62 = vsel %vm1102_vm3, %v2878_v60, 0.0 }
 0x496   : > { %1312 = vadd.xlane.f32.xlu1 %v1311_v62  ;;  %v1314_v33 = vsel %vm1102_vm3, %v2880_v61, 0.0 }
 0x497   : > { %1315 = vadd.xlane.f32.xlu0 %v1314_v33 }
 0x49c   : > { %v2888_v7 = vpop.eup %2450 }
 0x49d   : > { %v1317_v9 = vsel %vm1102_vm3, %v2888_v7, 0.0 }
 0x4a0   : > { %v2890_v8 = vpop.eup %2452 }
 0x4a1   : > { %v1320_v10 = vsel %vm1102_vm3, %v2890_v8, 0.0 }
 0x4a7   : > { %954 = vrot.lane.b32.xlu1 %v947_v50, %s2573_s13 }
 0x4ad   : > { %956 = vrot.lane.b32.xlu0 %v949_v51, %s2573_s13 }
 0x4cb   : > { %1318 = vadd.xlane.f32.xlu1 %v1317_v9 }
 0x4cc   : > { %1321 = vadd.xlane.f32.xlu0 %v1320_v10 }
 0x51f   : > { %v1313_v13 = vpop.xlane.xlu1 %1312 }
 0x520   : > { %v1316_v14 = vpop.xlane.xlu0 %1315  ;;  %2454 = vrcp.f32 %v1313_v13 }
 0x521   : > { %2456 = vrcp.f32 %v1316_v14 }
 0x523   : > { %v955_v15 = vpop.permute.xlu1 %954 }
 0x524   : > { %v962_v16 = vcombine.low %v951_v12, %v955_v15  ;;  %v963_v17 = vcombine.high %v951_v12, %v955_v15  ;;  %v957_v18 = vpop.permute.xlu0 %956 }
 0x525   : > { %v978_v19 = vcombine.low %v953_v11, %v957_v18  ;;  %v979_v20 = vcombine.high %v953_v11, %v957_v18 }
 0x526   : > { %v970_v22 = vrot.slane %v962_v16, %v2805_v52  ;;  %v977_v25 = vrot.slane %v963_v17, %v2805_v52 }
 0x527   : > { %v986_v26 = vrot.slane %v978_v19, %v2805_v52  ;;  %v993_v27 = vrot.slane %v979_v20, %v2805_v52 }
 0x529   : > { %v994_v28 = vcombine.low %v970_v22, %v986_v26  ;;  %v995_v30 = vcombine.high %v970_v22, %v986_v26  ;;  %v1010_v31 = vcombine.low %v977_v25, %v993_v27  ;;  %v1011_v32 = vcombine.high %v977_v25, %v993_v27 }
 0x52b   : > { %v1002_v34 = vrot.slane %v994_v28, %v2808_v59  ;;  %v1009_v35 = vrot.slane %v995_v30, %v2808_v59  ;;  %v1018_v36 = vrot.slane %v1010_v31, %v2808_v59  ;;  %v1025_v37 = vrot.slane %v1011_v32, %v2808_v59 }
 0x52d   : > { %v1030_v38 = vcombine.low %v1002_v34, %v1009_v35  ;;  %v2186_v39 = vcombine.high %v1002_v34, %v1009_v35  ;;  %v1046_v40 = vcombine.low %v1018_v36, %v1025_v37  ;;  %v2187_v29 = vcombine.high %v1018_v36, %v1025_v37  ;;  %v2455_v49 = vpop.eup %2454 }
 0x52e   : > { %v2457_v55 = vpop.eup %2456  ;;  %v1327_v2 = vmul.f32 %v2455_v49, %v2878_v60  ;;  %v2438_v49 = vld [vmem:[%s2730_s30 + $0x8] sm:$0xff]  }
 0x52f   : > { %v1037_v41 = vrot.slane %v1030_v38, %v2805_v52  ;;  %v1045_v42 = vrot.slane %v2186_v39, %v2805_v52  ;;  %v1053_v43 = vrot.slane %v1046_v40, %v2805_v52  ;;  %v1061_v44 = vrot.slane %v2187_v29, %v2805_v52 }
 0x530   : > { %v1328_v3 = vmul.f32 %v2457_v55, %v2880_v61  ;;  %v1331_v10 = vpack.c.bf16 %v1327_v2, %v1327_v2 }
 0x531   : > { %v1062_v45 = vcombine.low %v1037_v41, %v1045_v42  ;;  %v1078_v46 = vcombine.low %v1053_v43, %v1061_v44  ;;  %v1063_v47 = vcombine.high %v1037_v41, %v1045_v42  ;;  %v1079_v48 = vcombine.high %v1053_v43, %v1061_v44 }
 0x532   : > { %v1332_v11 = vpack.c.bf16 %v1328_v3, %v1328_v3 }
 0x533   : > { %v1070_v50 = vrot.slane %v1062_v45, %v2808_v59  ;;  %v1086_v51 = vrot.slane %v1078_v46, %v2808_v59  ;;  %v1077_v53 = vrot.slane %v1063_v47, %v2808_v59  ;;  %v1093_v54 = vrot.slane %v1079_v48, %v2808_v59 }
 0x535   : > { %v1094_v56 = vcombine.low %v1070_v50, %v1086_v51  ;;  %v1095_v57 = vcombine.high %v1070_v50, %v1086_v51  ;;  %v1096_v58 = vcombine.low %v1077_v53, %v1093_v54  ;;  %v1097_v62 = vcombine.high %v1077_v53, %v1093_v54 }
 0x537   : > { %v1098_v33 = vpack.c.bf16 %v1094_v56, %v1094_v56  ;;  %v1099_v63 = vpack.c.bf16 %v1095_v57, %v1095_v57  ;;  %v1100_v6 = vpack.c.bf16 %v1096_v58, %v1096_v58  ;;  %v1101_v9 = vpack.c.bf16 %v1097_v62, %v1097_v62 }
 0x539   : > { %v1340_v4 = vsel %vm1338_vm4, %v1098_v33, 0  ;;  %v1386_v5 = vsel %vm1338_vm4, %v1099_v63, 0  ;;  %v1432_v60 = vsel %vm1338_vm4, %v1100_v6, 0  ;;  %v1478_v61 = vsel %vm1338_vm4, %v1101_v9, 0  ;;  %v2439_v33 = vld [vmem:[%s2730_s30] sm:$0xff]   ;;  %s2576_s30 = smov 16  }
 0x53a   : > { %2289 = vmatpush3.bf16.msra.mxu1 %v1340_v4  ;;  %2295 = vmatpush3.bf16.msra.mxu0 %v1386_v5 }
 0x53b   : > { %2300 = vmatprep.subr.bf16.mxu1 %v2566_v21  ;;  %2306 = vmatprep.subr.bf16.mxu0 %v2566_v21 }
 0x53d   : > { %2291 = vmatmul.mubr.msk.bf16.vlgmr.msra.gmra.mxu1 %vm1102_vm3, %v1331_v10  ;;  %2297 = vmatmul.mubr.msk.bf16.vlgmr.msra.gmra.mxu0 %vm1102_vm3, %v1332_v11 }
 0x53e   : > { %2301 = vmatpush3.bf16.msra.mxu1 %v1432_v60  ;;  %2307 = vmatpush3.bf16.msra.mxu0 %v1478_v61 }
 0x53f   : > { %2302 = vmatprep.mubr.msk.bf16.mxu1 %vm2567_vm1, %v2566_v21  ;;  %2308 = vmatprep.mubr.msk.bf16.mxu0 %vm2567_vm1, %v2566_v21 }
 0x540   : > { %2312 = vmatprep.subr.bf16.mxu1 %v2566_v21  ;;  %2320 = vmatprep.subr.bf16.mxu0 %v2566_v21 }
 0x554   : > { %v1319_v12 = vpop.xlane.xlu1 %1318 }
 0x555   : > { %2458 = vrcp.f32 %v1319_v12  ;;  %v1322_v13 = vpop.xlane.xlu0 %1321 }
 0x556   : > { %2460 = vrcp.f32 %v1322_v13 }
 0x562   : > { %v2459_v14 = vpop.eup %2458 }
 0x563   : > { %v2461_v15 = vpop.eup %2460  ;;  %v1329_v16 = vmul.f32 %v2459_v14, %v2888_v7 }
 0x564   : > { %v1330_v17 = vmul.f32 %v2461_v15, %v2890_v8 }
 0x565   : > { %v1333_v18 = vpack.c.bf16 %v1329_v16, %v1329_v16 }
 0x566   : > { %v1334_v19 = vpack.c.bf16 %v1330_v17, %v1330_v17 }
 0x567   : > { %2303 = vmatmul.mubr.msk.bf16.vlgmr.msra.gmra.mxu1 %vm1102_vm3, %v1333_v18 }
 0x568   : > { %2309 = vmatmul.mubr.msk.bf16.vlgmr.msra.gmra.mxu0 %vm1102_vm3, %v1334_v19  ;;  %2316 = vmatprep.mubr.msk.bf16.mxu1 %vm2567_vm1, %v2566_v21 }
 0x569   : > { %2324 = vmatprep.mubr.msk.bf16.mxu0 %vm2567_vm1, %v2566_v21  ;;  %2313 = vmatpush3.bf16.msra.mxu1 %v2438_v49 }
 0x56a   : > { %2314 = vmatprep.subr.bf16.mxu1 %v2566_v21 }
 0x56d   : > { %2315 = vmatpush3.bf16.msra.mxu1 %v2439_v33 }
 0x56e   : > { %2328 = vmatprep.subr.bf16.mxu1 %v2566_v21 }
 0x5fd   : > { %v1376_v20 = vpop.f32.mrf.mxu1  ;;  %v1422_v22 = vpop.f32.mrf.mxu0 }
 0x5ff   : > { %v2292_v25 = vpop.f32.mrf.mxu1  ;;  %v2298_v26 = vpop.f32.mrf.mxu0 }
 0x600   : > { %v1680_v25 = vsub.s32 3, %v2776_v24 }
 0x601   : > { %v1379_v27 = vpop.f32.mrf.mxu1  ;;  %v1425_v7 = vpop.f32.mrf.mxu0 }
 0x602   : > { %v1681_v26 = vrot.slane %v2750_v0, %v1680_v25 }
 0x603   : > { %v2293_v28 = vpop.f32.mrf.mxu1  ;;  %v2299_v8 = vpop.f32.mrf.mxu0 }
 0x627   : > { %v1468_v30 = vpop.f32.mrf.mxu1 }
 0x628   : > { %v1520_v31 = vcombine.low %v1376_v20, %v1468_v30  ;;  %v1521_v32 = vcombine.high %v1376_v20, %v1468_v30  ;;  %v1514_v34 = vpop.f32.mrf.mxu0 }
 0x629   : > { %v1536_v35 = vcombine.low %v1422_v22, %v1514_v34  ;;  %v1537_v36 = vcombine.high %v1422_v22, %v1514_v34  ;;  %v2304_v37 = vpop.f32.mrf.mxu1 }
 0x62a   : > { %v1528_v38 = vrot.slane %v1520_v31, %v2805_v52  ;;  %v1535_v39 = vrot.slane %v1521_v32, %v2805_v52  ;;  %v2310_v40 = vpop.f32.mrf.mxu0 }
 0x62b   : > { %v1544_v29 = vrot.slane %v1536_v35, %v2805_v52  ;;  %v1551_v41 = vrot.slane %v1537_v36, %v2805_v52  ;;  %v1471_v42 = vpop.f32.mrf.mxu1  ;;  %v2441_v40 = vld [vmem:[%s2735_s11] sm:$0xff]  }
 0x62c   : > { %v1517_v43 = vpop.f32.mrf.mxu0  ;;  %v1754_v42 = vsub.s32 4, %v2776_v24 }
 0x62d   : > { %v1552_v44 = vcombine.low %v1528_v38, %v1544_v29  ;;  %v1553_v45 = vcombine.high %v1528_v38, %v1544_v29  ;;  %v1568_v46 = vcombine.low %v1535_v39, %v1551_v41  ;;  %v1569_v47 = vcombine.high %v1535_v39, %v1551_v41  ;;  %v2305_v48 = vpop.f32.mrf.mxu1  ;;  %v2440_v39 = vld [vmem:[%s2735_s11 + $0x8] sm:$0xff]  }
 0x62e   : > { %v2311_v50 = vpop.f32.mrf.mxu0  ;;  %2321 = vmatpush3.bf16.msra.mxu0 %v2440_v39  ;;  %v1759_v43 = vsub.s32 5, %v2776_v24 }
 0x62f   : > { %v1560_v51 = vrot.slane %v1552_v44, %v2808_v59  ;;  %v1567_v53 = vrot.slane %v1553_v45, %v2808_v59  ;;  %v1576_v54 = vrot.slane %v1568_v46, %v2808_v59  ;;  %v1583_v55 = vrot.slane %v1569_v47, %v2808_v59  ;;  %2322 = vmatprep.subr.bf16.mxu0 %v2566_v21 }
 0x630   : > { %v1755_v44 = vrot.slane %v2750_v0, %v1754_v42  ;;  %v1760_v47 = vrot.slane %v2750_v0, %v1759_v43 }
 0x631   : > { %v1588_v56 = vcombine.low %v1560_v51, %v1567_v53  ;;  %v2196_v57 = vcombine.high %v1560_v51, %v1567_v53  ;;  %v1604_v58 = vcombine.low %v1576_v54, %v1583_v55  ;;  %v2197_v62 = vcombine.high %v1576_v54, %v1583_v55  ;;  %v2442_v51 = vld [vmem:[%s2748_s19 + $0x18] sm:$0xff]   ;;  %v2443_v53 = vld [vmem:[%s2748_s19 + $0x10] sm:$0xff]   ;;  %v2444_v54 = vld [vmem:[%s2748_s19 + $0x8] sm:$0xff]  }
 0x632   : > { %2323 = vmatpush3.bf16.msra.mxu0 %v2441_v40  ;;  %v2445_v55 = vld [vmem:[%s2748_s19] sm:$0xff]  }
 0x633   : > { %v1595_v63 = vrot.slane %v1588_v56, %v2805_v52  ;;  %v1603_v2 = vrot.slane %v2196_v57, %v2805_v52  ;;  %v1611_v3 = vrot.slane %v1604_v58, %v2805_v52  ;;  %v1619_v4 = vrot.slane %v2197_v62, %v2805_v52  ;;  %v2201_v56 = vld [vmem:[%s496_s26] ss:$0 sm:$0xff] }
 0x635   : > { %v1621_v5 = vcombine.high %v1595_v63, %v1603_v2  ;;  %v1637_v6 = vcombine.high %v1611_v3, %v1619_v4  ;;  %v1620_v9 = vcombine.low %v1595_v63, %v1603_v2  ;;  %v1636_v10 = vcombine.low %v1611_v3, %v1619_v4 }
 0x637   : > { %v1635_v11 = vrot.slane %v1621_v5, %v2808_v59  ;;  %v1651_v60 = vrot.slane %v1637_v6, %v2808_v59  ;;  %v1628_v61 = vrot.slane %v1620_v9, %v2808_v59  ;;  %v1644_v12 = vrot.slane %v1636_v10, %v2808_v59 }
 0x639   : > { %v1654_v13 = vcombine.low %v1635_v11, %v1651_v60  ;;  %v1653_v14 = vcombine.high %v1628_v61, %v1644_v12  ;;  %v1652_v15 = vcombine.low %v1628_v61, %v1644_v12  ;;  %v1655_v52 = vcombine.high %v1635_v11, %v1651_v60 }
 0x63a   : > { %v1849_v61 = vsub.s32 6, %v2776_v24 }
 0x63b   : > { %1661 = vrot.lane.b32.xlu1 %v1654_v13, %s2576_s30  ;;  %1657 = vrot.lane.b32.xlu0 %v1653_v14, %s2577_s22 }
 0x63c   : > { %v1850_v12 = vrot.slane %v2750_v0, %v1849_v61 }
 0x63f   : > { %1665 = vrot.lane.b32.xlu1 %v1655_v52, %s2578_s23 }
 0x6ad   : > { %v1662_v16 = vpop.permute.xlu1 %1661  ;;  %v1658_v17 = vpop.permute.xlu0 %1657 }
 0x6ae   : > { %v1668_v18 = vsel %vm1102_vm3, %v1652_v15, %v1658_v17 }
 0x6af   : > { %v1670_v20 = vsel %vm1669_vm5, %v1668_v18, %v1662_v16 }
 0x6b1   : > { %v1666_v19 = vpop.permute.xlu1 %1665 }
 0x6b2   : > { %v1672_v22 = vsel %vm1671_vm6, %v1670_v20, %v1666_v19 }
 0x6b3   : > { %v1673_v59 = vpack.c.bf16 %v1672_v22, %v1672_v22 }
 0x6b5   : > { %2317 = vmatmul.mubr.msk.bf16.vlgmr.msra.gmra.mxu1 %vm566_vm2, %v1673_v59 }
 0x6b6   : > { %2336 = vmatprep.mubr.msk.bf16.mxu1 %vm2567_vm1, %v2566_v21  ;;  %2329 = vmatpush3.bf16.msra.mxu1 %v2442_v51 }
 0x6b7   : > { %2330 = vmatprep.subr.bf16.mxu1 %v2566_v21 }
 0x6ba   : > { %2331 = vmatpush3.bf16.msra.mxu1 %v2443_v53 }
 0x6bb   : > { %2332 = vmatprep.subr.bf16.mxu1 %v2566_v21 }
 0x6be   : > { %2333 = vmatpush3.bf16.msra.mxu1 %v2444_v54 }
 0x6bf   : > { %2334 = vmatprep.subr.bf16.mxu1 %v2566_v21 }
 0x6c2   : > { %2335 = vmatpush3.bf16.msra.mxu1 %v2445_v55 }
 0x775   : > { %v1731_v27 = vpop.f32.mrf.mxu1 }
 0x776   : > { %v1732_v7 = vadd.f32 %v1731_v27, %v1681_v26 }
 0x777   : > { %v2318_v28 = vpop.f32.mrf.mxu1 }
 0x778   : > { %v1737_v8 = vadd.f32 %v1732_v7, %v2774_v23  ;;  %v1935_v28 = vsub.s32 7, %v2776_v24 }
 0x779   : > { %v1734_v30 = vpop.f32.mrf.mxu1 }
 0x77a   : > { %v1738_v31 = vsel %vm566_vm2, %v1737_v8, 0.0 }
 0x77b   : > { %1739 = vadd.xlane.f32.xlu0 %v1738_v31  ;;  %v2319_v32 = vpop.f32.mrf.mxu1 }
 0x804   : > { %v1740_v34 = vpop.xlane.xlu0 %1739 }
 0x805   : > { %v1742_v35 = vmul.f32 0.03125, %v1740_v34 }
 0x807   : > { %v1743_v36 = vsub.f32 %v1737_v8, %v1742_v35  ;;  %v1936_v8 = vrot.slane %v2750_v0, %v1935_v28 }
 0x809   : > { %v1744_v37 = vmul.f32 %v1743_v36, %v1743_v36 }
 0x80b   : > { %v1745_v38 = vsel %vm566_vm2, %v1744_v37, 0.0 }
 0x80c   : > { %1746 = vadd.xlane.f32.xlu1 %v1745_v38 }
 0x895   : > { %v1747_v23 = vpop.xlane.xlu1 %1746 }
 0x896   : > { %v1748_v29 = vmul.f32 0.03125, %v1747_v23 }
 0x898   : > { %v1749_v41 = vadd.f32 1e-12, %v1748_v29 }
 0x89a   : > { %2462 = vrsqrt.f32 %v1749_v41 }
 0x8a7   : > { %v2463_v45 = vpop.eup %2462 }
 0x8a8   : > { %v1751_v46 = vmul.f32 %v2463_v45, %v1743_v36 }
 0x8aa   : > { %v1756_v48 = vmul.f32 %v1755_v44, %v1751_v46 }
 0x8ac   : > { %v1761_v49 = vadd.f32 %v1760_v47, %v1756_v48 }
 0x8ae   : > { %v1762_v50 = vpack.c.bf16 %v1761_v49, %v1761_v49 }
 0x8b0   : > { %2325 = vmatmul.mubr.msk.bf16.vlgmr.msra.gmra.mxu0 %vm566_vm2, %v1762_v50 }
 0x970   : > { %v1823_v57 = vpop.f32.mrf.mxu0 }
 0x971   : > { %v1824_v58 = vadd.f32 %v2201_v56, %v1823_v57 }
 0x972   : > { %v2326_v62 = vpop.f32.mrf.mxu0 }
 0x973   : > { %v1830_v33 = vmul.f32 0.044715, %v1824_v58  ;;  %v1829_v10 = vmul.f32 0.5, %v1824_v58 }
 0x974   : > { %v1826_v63 = vpop.f32.mrf.mxu0 }
 0x975   : > { %v1831_v2 = vmul.f32 %v1830_v33, %v1824_v58 }
 0x976   : > { %v2327_v3 = vpop.f32.mrf.mxu0 }
 0x977   : > { %v1832_v4 = vmul.f32 %v1831_v2, %v1824_v58 }
 0x979   : > { %v1833_v5 = vadd.f32 %v1832_v4, %v1824_v58 }
 0x97b   : > { %v1834_v6 = vmul.f32 0.7978846, %v1833_v5 }
 0x97d   : > { %2464 = vtanh.f32 %v1834_v6 }
 0x98a   : > { %v2465_v9 = vpop.eup %2464 }
 0x98b   : > { %v1836_v21 = vadd.f32 1.0, %v2465_v9 }
 0x98d   : > { %v1837_v11 = vmul.f32 %v1836_v21, %v1829_v10 }
 0x98f   : > { %v1838_v60 = vpack.c.bf16 %v1837_v11, %v1837_v11 }
 0x991   : > { %2337 = vmatmul.mubr.msk.bf16.vlgmr.msra.gmra.mxu1 %vm1875_vm7, %v1838_v60 }
 0xa51   : > { %v1913_v13 = vpop.f32.mrf.mxu1 }
 0xa52   : > { %v1914_v14 = vadd.f32 %v1913_v13, %v1850_v12 }
 0xa53   : > { %v2338_v15 = vpop.f32.mrf.mxu1 }
 0xa54   : > { %v1919_v52 = vadd.f32 %v1914_v14, %v1761_v49 }
 0xa55   : > { %v1916_v16 = vpop.f32.mrf.mxu1 }
 0xa56   : > { %v1920_v17 = vsel %vm566_vm2, %v1919_v52, 0.0 }
 0xa57   : > { %1921 = vadd.xlane.f32.xlu0 %v1920_v17  ;;  %v2339_v18 = vpop.f32.mrf.mxu1 }
 0xae0   : > { %v1922_v19 = vpop.xlane.xlu0 %1921 }
 0xae1   : > { %v1923_v20 = vmul.f32 0.03125, %v1922_v19 }
 0xae3   : > { %v1924_v22 = vsub.f32 %v1919_v52, %v1923_v20 }
 0xae5   : > { %v1925_v59 = vmul.f32 %v1924_v22, %v1924_v22 }
 0xae7   : > { %v1926_v25 = vsel %vm566_vm2, %v1925_v59, 0.0 }
 0xae8   : > { %1927 = vadd.xlane.f32.xlu0 %v1926_v25 }
 0xb71   : > { %v1928_v26 = vpop.xlane.xlu0 %1927 }
 0xb72   : > { %v1929_v27 = vmul.f32 0.03125, %v1928_v26 }
 0xb74   : > { %v1930_v7 = vadd.f32 1e-12, %v1929_v27 }
 0xb76   : > { %2466 = vrsqrt.f32 %v1930_v7 }
 0xb83   : > { %v2467_v30 = vpop.eup %2466 }
 0xb84   : > { %v1932_v31 = vmul.f32 %v2467_v30, %v1924_v22 }
 0xb86   : > { %v1937_v32 = vmul.f32 %v1936_v8, %v1932_v31  ;;  %1947 = sbr.rel (%p2211_p1) target bundleno = 3174 (0xc66), region = 72 }
 0xb88   : > { %v1942_v34 = vadd.f32 %v2752_v1, %v1937_v32 }
 0xb8a   : > { %1943 = vst.msk [vmem:[#allocation2] sm:$0xff] %vm566_vm2, %v1942_v34 }
 0xb8b   : > { %v2468_v35 = vld [vmem:[%s3061_s9 + $0x8] sm:$0xff]   ;;  %v2579_v36 = vmov 0.0   ;;  %v2469_v0 = vld [vmem:[%s3061_s9] sm:$0xff]   ;;  %vm2580_vm8 = vmmov 0   ;;  %v1948_v1 = vpack.c.bf16 %v1942_v34, %v1942_v34  ;;  %vm2010_vm9 = vcmask 253952  }
 0xb8c   : > { %2340 = vmatprep.subr.bf16.mxu0 %v2579_v36  ;;  %2344 = vmatprep.mubr.msk.bf16.mxu0 %vm2580_vm8, %v2579_v36  ;;  %v1953_v24 = vld [vmem:[%s3062_s10] sm:$0x1] }
 0xb8d   : > { %2341 = vmatpush3.bf16.msra.mxu0 %v2468_v35 }
 0xb8e   : > { %2342 = vmatprep.subr.bf16.mxu0 %v2579_v36 }
 0xb91   : > { %2343 = vmatpush3.bf16.msra.mxu0 %v2469_v0 }
 0xb94   : > { %2345 = vmatmul.mubr.msk.bf16.vlgmr.msra.gmra.mxu0 %vm566_vm2, %v1948_v1 }
 0xc54   : > { %v2003_v37 = vpop.f32.mrf.mxu0 }
 0xc55   : > { %v2004_v38 = vadd.f32 %v2003_v37, %v1953_v24 }
 0xc56   : > { %v2346_v39 = vpop.f32.mrf.mxu0 }
 0xc57   : > { %2470 = vtanh.f32 %v2004_v38 }
 0xc58   : > { %v2006_v40 = vpop.f32.mrf.mxu0 }
 0xc5a   : > { %v2347_v23 = vpop.f32.mrf.mxu0 }
 0xc64   : > { %v2471_v29 = vpop.eup %2470 }
 0xc65   : > { %2011 = vst.msk [vmem:[%s2756_s24] sm:$0x1] %vm2010_vm9, %v2471_v29 }
 0xc66 PF: > { %s2215_s28 = sshll.u32 %s2552_s21, 4  ;;  %s3094_s15 = sld [smem:[#allocation18_spill]] }
 0xc67   : > { %s2025_s12 = sshll.u32 %s2756_s24, 4  ;;  %s3095_s13 = sand.u32 1, %s2540_s18   ;;  %s2026_s12 = int_to_ptr.vmem [resolvable:$true] %s2025_s12 }
 0xc68   : > { %s2013_s30 = scalar_lea.sflag [#allocation4], %s3095_s13  ;;  %s2472_s22 = scalar_lea.vmem %s2026_s12, 16 }
 0xc69   : > { %p2473_p2 = scmp.ne.s32.totalorder %s2026_s12, %s2472_s22  ;;  %s2581_s23 = smov [#allocation3]  }
 0xc6a   : > { %s2476_s11 = sshll.u32 %s2581_s23, 4  ;;  %s2477_s11 = int_to_ptr.vmem [resolvable:$false] %s2476_s11 }
 0xc6b   : > { %p2474_p4 = pnand %p2473_p2, %p2691_p3  ;;  %s2478_s17 = scalar_lea.vmem %s2477_s11, 32 }
 0xc6c   : > { %s2023_s16 = scalar_lea.hbm %s3094_s15, %s2215_s28  ;;  %p2479_p6 = scmp.lt.s32.totalorder %s2026_s12, %s2477_s11 }
 0xc6d   : > { %p2475_p5 = pneg %p2474_p4  ;;  %p2480_p7 = scmp.lt.s32.totalorder %s2478_s17, %s2472_s22 }
 0xc6f   : > { %p2481_p8 = por %p2480_p7, %p2479_p6 }
 0xc71   : > { %p2482_p10 = pnand %p2481_p8, %p2475_p5 }
 0xc73   : > { %2485 = shalt.err (!%p2482_p10)
}
 0xc74   : > { %s2486_s21 = scalar_lea.hbm %s2023_s16, 16  ;;  %s2490_s26 = scalar_lea.hbm %s3094_s15, 32 }
 0xc75   : > { %p2487_p11 = scmp.ne.s32.totalorder %s2023_s16, %s2486_s21  ;;  %p2491_p0 = scmp.lt.s32.totalorder %s2023_s16, %s3094_s15 }
 0xc76   : > { %p2492_p1 = scmp.lt.s32.totalorder %s2490_s26, %s2486_s21 }
 0xc77   : > { %p2488_p12 = pnand %p2487_p11, %p2691_p3 }
 0xc78   : > { %p2493_p2 = por %p2492_p1, %p2491_p0 }
 0xc79   : > { %p2489_p13 = pneg %p2488_p12 }
 0xc7b   : > { %p2494_p4 = pnand %p2493_p2, %p2489_p13 }
 0xc7d   : > { %2497 = shalt.err (!%p2494_p4)
}
 0xc7e   : > { %2348 = dma.vmem_to_hbm [thread:$0]  (%p2691_p3), %s2026_s12, 16, %s2023_s16, %s2013_s30  }
 0xc7f PF: > { %s3096_s20 = sld [smem:[#allocation10_spill]] }
 0xc80   : > { %s3097_s3 = sld [smem:[#allocation6_spill]] }
 0xc85   : > { %p2354_p5 = scmp.ge.s32.totalorder %s3096_s20, 2 }
 0xc86   : > { %s2037_s29 = sand.u32 1, %s3097_s3  }
 0xc87   : > { %p2351_p6 = pnand %p2354_p5, %p2701_p9  ;;  %s2038_s14 = scalar_lea.sflag [#allocation4], %s2037_s29 }
 0xc89   : > { %p2352_p7 = pneg %p2351_p6 }
 0xc8b   : > { %2531 = dma.done.wait (%p2352_p7), %s2038_s14, 16  }
 0xc8c   : > { %2533 = vsyncadd (%p2352_p7), %s2038_s14, 4294967280  ;;  %s24_s24 = sadd.s32 1, %s3096_s20   ;;  %s3099_s13 = sld [smem:[#allocation7_spill]] }
 0xc8d   : > { %p21_p8 = scmp.ge.s32.totalorder %s24_s24, 6   ;;  %s3100_s19 = sld [smem:[#allocation15_spill]] }
 0xc8e   : > { %s3101_s20 = sld [smem:[#allocation8_spill]]  ;;  %s3105_s17 = smov %s2540_s18 }
 0xc8f   : > { %s3102_s21 = sld [smem:[#allocation9_spill]]  ;;  %23 = sbr.rel (!%p21_p8) target bundleno = 9 (0x9), region = 125 }
 0xc90   : > { %s3103_s22 = sld [smem:[#allocation11_spill]] }
 0xc91   : > { %s3104_s23 = sld [smem:[#allocation13_spill]] }
 0xc92   : > { %s3106_s18 = smov %s3099_s13 }
 0xc94   :  { %2042 = vsyncpa [#allocation4], 1 }
 0xc95   :  { %2044 = vsyncpa [#allocation4 + $0x1], 1 }

</bundles_post_ra>
